<compile_context>
chip_gen: v7x
topology: tpu7x:2x2x1
jax: 0.10.0
libtpu: 0.0.40
codegen_flags: <defaults>
</compile_context>

<pallas_src>
import functools

import jax
import jax.numpy as jnp
from jax.experimental import pallas as pl
from jax.experimental.pallas import tpu as pltpu

BN_EPS = 1e-5
LANE = 128
SUBLANE = 8


def _round_up(x, m):
    return (x + m - 1) // m * m


# --------------------------- Pass 1: conv + stats ---------------------------
def conv_stats_kernel(p_ref, w_ref, y_ref, stats_ref):
    # conv-as-matmul on the MXU; bf16 inputs, f32 accumulation.
    y = jnp.dot(p_ref[...], w_ref[...], preferred_element_type=jnp.float32)
    y_ref[...] = y
    # Per-tile partial BatchNorm statistics (sum and sum of squares).
    s = jnp.sum(y, axis=0, keepdims=True)        # (1, Cp)
    ss = jnp.sum(y * y, axis=0, keepdims=True)   # (1, Cp)
    row = jax.lax.broadcasted_iota(jnp.int32, (SUBLANE, 1), 0)
    stats_ref[...] = jnp.where(row == 0, s, jnp.where(row == 1, ss, 0.0))


# ----------------------- Pass 2: BN affine + (res) + ReLU -------------------
def bn_relu_kernel(y_ref, scale_ref, shift_ref, o_ref):
    o_ref[...] = jnp.maximum(y_ref[...] * scale_ref[...] + shift_ref[...], 0.0)


def bn_relu_res_kernel(y_ref, scale_ref, shift_ref, res_ref, o_ref):
    o_ref[...] = jnp.maximum(
        y_ref[...] * scale_ref[...] + shift_ref[...] + res_ref[...], 0.0)


# --------------------------------- glue -------------------------------------
def _same_padding(T, spatial, k, stride):
    # Reproduces the PyTorch module's default padding branch
    # (padding_type is None, scalar stride): hps.T -> T, prev_dim -> spatial.
    d1 = ((T - 1) * stride - T + k) // 2
    d2 = ((spatial - 1) * stride - spatial + k) // 2
    d3 = ((spatial - 1) * stride - spatial + k) // 2
    return (d1, d2, d3)


def _im2col_3d(x, k, stride, padding):
    # x: (N, C, D, H, W) -> (N*Do*Ho*Wo, C*k^3); column order matches torch
    # Conv3d weight flattening (c, kd, kh, kw).
    N, C, D, H, W = x.shape
    pd, ph, pw = padding
    sd = sh = sw = stride
    xp = jnp.pad(x, ((0, 0), (0, 0), (pd, pd), (ph, ph), (pw, pw)))
    Do = (D + 2 * pd - k) // sd + 1
    Ho = (H + 2 * ph - k) // sh + 1
    Wo = (W + 2 * pw - k) // sw + 1
    taps = []
    for dz in range(k):
        for dy in range(k):
            for dx in range(k):
                taps.append(xp[:, :, dz:dz + sd * Do:sd,
                               dy:dy + sh * Ho:sh,
                               dx:dx + sw * Wo:sw])
    p = jnp.stack(taps, axis=2)                 # (N, C, k^3, Do, Ho, Wo)
    p = jnp.transpose(p, (0, 3, 4, 5, 1, 2))    # (N, Do, Ho, Wo, C, k^3)
    return p.reshape(N * Do * Ho * Wo, C * k * k * k), (Do, Ho, Wo)


def _pick_tm(M, Kp, Cp, budget_bytes=16 * 1024 * 1024):
    # Double-buffered bf16 patches tile + f32 y tiles (pass1 in+out / pass2).
    per_row = Kp * 2 * 2 + Cp * 4 * 2 * 2
    tm = (budget_bytes // per_row) // LANE * LANE
    tm = max(SUBLANE, min(1024, tm))
    tm = min(tm, _round_up(M, SUBLANE))   # avoid huge over-padding on tiny M
    return tm


def conv3d_forward(x, weight, bias, gamma, beta, *, kernel_size, stride,
                   residual):
    """Forward pass of the lip2wav Conv3d module. x: (N, Cin, T, H, W)."""
    del bias  # cancelled exactly by training-mode BatchNorm mean subtraction
    N, Cin, T, H, W = x.shape
    Cout = weight.shape[0]
    k = kernel_size
    padding = _same_padding(T, H, k, stride)

    patches, (Do, Ho, Wo) = _im2col_3d(x, k, stride, padding)
    M, K = patches.shape

    Kp = _round_up(K, LANE)
    Cp = _round_up(Cout, LANE)
    tm = _pick_tm(M, Kp, Cp)
    grid_m = pl.cdiv(M, tm)
    M_pad = grid_m * tm

    # bf16, zero-padded operands (zero rows/cols contribute 0 to sum & sumsq).
    patches_p = jnp.pad(patches.astype(jnp.bfloat16),
                        ((0, M_pad - M), (0, Kp - K)))
    w2d = weight.reshape(Cout, Cin * k ** 3).T.astype(jnp.bfloat16)
    w_p = jnp.pad(w2d, ((0, Kp - K), (0, Cp - Cout)))

    tile_in_spec = pl.BlockSpec((tm, Kp), lambda i: (i, 0))
    w_spec = pl.BlockSpec((Kp, Cp), lambda i: (0, 0))
    tile_out_spec = pl.BlockSpec((tm, Cp), lambda i: (i, 0))
    stats_spec = pl.BlockSpec((SUBLANE, Cp), lambda i: (i, 0))

    flops1 = 2 * M_pad * Kp * Cp
    bytes1 = (patches_p.size * 2 + w_p.size * 2
              + M_pad * Cp * 4 + grid_m * SUBLANE * Cp * 4)

    y_pad, stats = pl.pallas_call(
        conv_stats_kernel,
        out_shape=(jax.ShapeDtypeStruct((M_pad, Cp), jnp.float32),
                   jax.ShapeDtypeStruct((grid_m * SUBLANE, Cp), jnp.float32)),
        grid=(grid_m,),
        in_specs=[tile_in_spec, w_spec],
        out_specs=(tile_out_spec, stats_spec),
        compiler_params=pltpu.CompilerParams(
            dimension_semantics=("parallel",)),
        cost_estimate=pl.CostEstimate(flops=flops1, transcendentals=0,
                                      bytes_accessed=bytes1),
    )(patches_p, w_p)

    # Fold BatchNorm (training-mode, biased variance) into scale/shift.
    stats3 = stats.reshape(grid_m, SUBLANE, Cp)
    ssum = jnp.sum(stats3[:, 0, :Cout], axis=0)
    ssq = jnp.sum(stats3[:, 1, :Cout], axis=0)
    mean = ssum / M
    var = jnp.maximum(ssq / M - mean * mean, 0.0)
    scale = gamma.astype(jnp.float32) * jax.lax.rsqrt(var + BN_EPS)
    shift = beta.astype(jnp.float32) - mean * scale
    scale_p = jnp.pad(scale, (0, Cp - Cout)).reshape(1, Cp)
    shift_p = jnp.pad(shift, (0, Cp - Cout)).reshape(1, Cp)

    vec_spec = pl.BlockSpec((1, Cp), lambda i: (0, 0))
    y_spec = pl.BlockSpec((tm, Cp), lambda i: (i, 0))
    cp2 = pltpu.CompilerParams(dimension_semantics=("parallel",))

    if residual:
        assert Cin == Cout and (Do, Ho, Wo) == (T, H, W), \
            "residual requires matching shapes"
        res = jnp.transpose(x, (0, 2, 3, 4, 1)).reshape(M, Cout)
        res_p = jnp.pad(res.astype(jnp.float32),
                        ((0, M_pad - M), (0, Cp - Cout)))
        out_pad = pl.pallas_call(
            bn_relu_res_kernel,
            out_shape=jax.ShapeDtypeStruct((M_pad, Cp), jnp.float32),
            grid=(grid_m,),
            in_specs=[y_spec, vec_spec, vec_spec, y_spec],
            out_specs=y_spec,
            compiler_params=cp2,
            cost_estimate=pl.CostEstimate(
                flops=4 * M_pad * Cp, transcendentals=0,
                bytes_accessed=3 * M_pad * Cp * 4),
        )(y_pad, scale_p, shift_p, res_p)
    else:
        out_pad = pl.pallas_call(
            bn_relu_kernel,
            out_shape=jax.ShapeDtypeStruct((M_pad, Cp), jnp.float32),
            grid=(grid_m,),
            in_specs=[y_spec, vec_spec, vec_spec],
            out_specs=y_spec,
            compiler_params=cp2,
            cost_estimate=pl.CostEstimate(
                flops=3 * M_pad * Cp, transcendentals=0,
                bytes_accessed=2 * M_pad * Cp * 4),
        )(y_pad, scale_p, shift_p)

    out = out_pad[:M, :Cout]
    return out.reshape(N, Do, Ho, Wo, Cout).transpose(0, 4, 1, 2, 3)


# ----------------------------- pure-JAX reference ----------------------------
def _reference_forward(x, weight, bias, gamma, beta, *, kernel_size, stride,
                       residual):
    N, Cin, T, H, W = x.shape
    Cout = weight.shape[0]
    padding = _same_padding(T, H, kernel_size, stride)
    patches, (Do, Ho, Wo) = _im2col_3d(x, kernel_size, stride, padding)
    y = patches @ weight.reshape(Cout, -1).T + bias[None, :]
    mean = y.mean(0, keepdims=True)
    var = ((y - mean) ** 2).mean(0, keepdims=True)
    y = (y - mean) * jax.lax.rsqrt(var + BN_EPS) * gamma[None, :] + beta[None, :]
    if residual:
        y = y + jnp.transpose(x, (0, 2, 3, 4, 1)).reshape(-1, Cout)
    y = jnp.maximum(y, 0.0)
    return y.reshape(N, Do, Ho, Wo, Cout).transpose(0, 4, 1, 2, 3)


if __name__ == "__main__":
    # Small shapes consistent with the module: N=2, Cin=Cout=4, T=8, H=W=16.
    N, Cin, Cout, T, H, W = 2, 4, 4, 8, 16, 16
    k, stride = 3, 1

    key = jax.random.PRNGKey(0)
    kw, kb, kx = jax.random.split(key, 3)

    # xavier_uniform_ with gain = calculate_gain('relu') = sqrt(2)
    fan_in = Cin * k ** 3
    fan_out = Cout * k ** 3
    bound = float(jnp.sqrt(2.0) * jnp.sqrt(6.0 / (fan_in + fan_out)))
    weight = jax.random.uniform(kw, (Cout, Cin, k, k, k), jnp.float32,
                                minval=-bound, maxval=bound)
    bbound = float(1.0 / jnp.sqrt(fan_in))
    bias = jax.random.uniform(kb, (Cout,), jnp.float32,
                              minval=-bbound, maxval=bbound)
    gamma = jnp.ones((Cout,), jnp.float32)
    beta = jnp.zeros((Cout,), jnp.float32)

    x = jax.random.normal(kx, (N, Cin, T, H, W), jnp.float32)

    ok = True
    for residual in (True, False):
        fwd = jax.jit(functools.partial(conv3d_forward, kernel_size=k,
                                        stride=stride, residual=residual))
        out = jax.block_until_ready(fwd(x, weight, bias, gamma, beta))
        ref = _reference_forward(x, weight, bias, gamma, beta, kernel_size=k,
                                 stride=stride, residual=residual)
        assert out.shape == (N, Cout, T, H, W)
        ok &= bool(jnp.allclose(out, ref, atol=2e-2, rtol=2e-2))

    assert ok
    print("KERNEL_OK")
</pallas_src>

<mosaic_0001>
module attributes {stable_mosaic.version = 11 : i64} {
  func.func @conv_stats_kernel(%arg0: i32, %arg1: memref<1024x128xbf16, #tpu.memory_space<vmem>>, %arg2: memref<128x128xbf16, #tpu.memory_space<vmem>>, %arg3: memref<1024x128xf32, #tpu.memory_space<vmem>>, %arg4: memref<8x128xf32, #tpu.memory_space<vmem>>) attributes {dimension_semantics = [#tpu.dimension_semantics<parallel>], iteration_bounds = array<i64: 4>, scalar_prefetch = 0 : i64, scratch_operands = 0 : i64, tpu.core_type = #tpu.core_type<tc>, window_params = [{transform_indices = @transform_0, window_bounds = array<i64: 1024, 128>}, {pipeline_mode = #tpu.pipeline_mode<synchronous>, transform_indices = @transform_1, window_bounds = array<i64: 128, 128>}, {transform_indices = @transform_2, window_bounds = array<i64: 1024, 128>}, {transform_indices = @transform_3, window_bounds = array<i64: 8, 128>}]} {
    %c0 = arith.constant 0 : index
    %c0_0 = arith.constant 0 : index
    %0 = vector.load %arg1[%c0, %c0_0] : memref<1024x128xbf16, #tpu.memory_space<vmem>>, vector<1024x128xbf16>
    %c0_1 = arith.constant 0 : index
    %c0_2 = arith.constant 0 : index
    %1 = vector.load %arg2[%c0_1, %c0_2] : memref<128x128xbf16, #tpu.memory_space<vmem>>, vector<128x128xbf16>
    %cst = arith.constant dense<0.000000e+00> : vector<1024x128xf32>
    %2 = tpu.matmul %0, %1, %cst {dimension_numbers = #tpu.dot_dimension_numbers<[1], [0], [0], [1], [0, 0, 1, 1], [], []>} : vector<1024x128xbf16>, vector<128x128xbf16>, vector<1024x128xf32> -> vector<1024x128xf32>
    %c0_3 = arith.constant 0 : index
    %c0_4 = arith.constant 0 : index
    %3 = vector.load %arg3[%c0_3, %c0_4] : memref<1024x128xf32, #tpu.memory_space<vmem>>, vector<1024x128xf32>
    tpu.vector_store %arg3[%c0_3, %c0_4], %2 {strides = array<i32>} : memref<1024x128xf32, #tpu.memory_space<vmem>>, vector<1024x128xf32>,
    %cst_5 = arith.constant dense<0.000000e+00> : vector<128xf32>
    %4 = vector.multi_reduction <add>, %2, %cst_5 [0] : vector<1024x128xf32> to vector<128xf32>
    %5 = vector.shape_cast %4 : vector<128xf32> to vector<1x128xf32>
    %6 = arith.mulf %2, %2 : vector<1024x128xf32>
    %cst_6 = arith.constant dense<0.000000e+00> : vector<128xf32>
    %7 = vector.multi_reduction <add>, %6, %cst_6 [0] : vector<1024x128xf32> to vector<128xf32>
    %8 = vector.shape_cast %7 : vector<128xf32> to vector<1x128xf32>
    %9 = tpu.iota {dimensions = array<i32: 0>} : vector<8x1xi32>
    %c0_i32 = arith.constant 0 : i32
    %10 = vector.broadcast %c0_i32 : i32 to vector<8x1xi32>
    %11 = arith.cmpi eq, %9, %10 : vector<8x1xi32>
    %c1_i32 = arith.constant 1 : i32
    %12 = vector.broadcast %c1_i32 : i32 to vector<8x1xi32>
    %13 = arith.cmpi eq, %9, %12 : vector<8x1xi32>
    %cst_7 = arith.constant 0.000000e+00 : f32
    %14 = vector.shape_cast %13 : vector<8x1xi1> to vector<8x1xi1>
    %15 = vector.broadcast %14 : vector<8x1xi1> to vector<8x128xi1>
    %16 = vector.shape_cast %8 : vector<1x128xf32> to vector<1x128xf32>
    %17 = vector.broadcast %16 : vector<1x128xf32> to vector<8x128xf32>
    %18 = vector.broadcast %cst_7 : f32 to vector<8x128xf32>
    %19 = arith.select %15, %17, %18 : vector<8x128xi1>, vector<8x128xf32>
    %20 = vector.shape_cast %11 : vector<8x1xi1> to vector<8x1xi1>
    %21 = vector.broadcast %20 : vector<8x1xi1> to vector<8x128xi1>
    %22 = vector.shape_cast %5 : vector<1x128xf32> to vector<1x128xf32>
    %23 = vector.broadcast %22 : vector<1x128xf32> to vector<8x128xf32>
    %24 = arith.select %21, %23, %19 : vector<8x128xi1>, vector<8x128xf32>
    %c0_8 = arith.constant 0 : index
    %c0_9 = arith.constant 0 : index
    %25 = vector.load %arg4[%c0_8, %c0_9] : memref<8x128xf32, #tpu.memory_space<vmem>>, vector<8x128xf32>
    tpu.vector_store %arg4[%c0_8, %c0_9], %24 {strides = array<i32>} : memref<8x128xf32, #tpu.memory_space<vmem>>, vector<8x128xf32>,
    return
  }
  func.func @transform_0(%arg0: i32) -> (i32, i32) {
    %c0_i32 = arith.constant 0 : i32
    %c0_i32_0 = arith.constant 0 : i32
    return %arg0, %c0_i32 : i32, i32
  }
  func.func @transform_1(%arg0: i32) -> (i32, i32) {
    %c0_i32 = arith.constant 0 : i32
    %c0_i32_0 = arith.constant 0 : i32
    %c0_i32_1 = arith.constant 0 : i32
    return %c0_i32, %c0_i32_0 : i32, i32
  }
  func.func @transform_2(%arg0: i32) -> (i32, i32) {
    %c0_i32 = arith.constant 0 : i32
    %c0_i32_0 = arith.constant 0 : i32
    return %arg0, %c0_i32 : i32, i32
  }
  func.func @transform_3(%arg0: i32) -> (i32, i32) {
    %c0_i32 = arith.constant 0 : i32
    %c0_i32_0 = arith.constant 0 : i32
    return %arg0, %c0_i32 : i32, i32
  }
}

module attributes {stable_mosaic.version = 11 : i64} {
  func.func @bn_relu_res_kernel(%arg0: i32, %arg1: memref<1024x128xf32, #tpu.memory_space<vmem>>, %arg2: memref<1x128xf32, #tpu.memory_space<vmem>>, %arg3: memref<1x128xf32, #tpu.memory_space<vmem>>, %arg4: memref<1024x128xf32, #tpu.memory_space<vmem>>, %arg5: memref<1024x128xf32, #tpu.memory_space<vmem>>) attributes {dimension_semantics = [#tpu.dimension_semantics<parallel>], iteration_bounds = array<i64: 4>, scalar_prefetch = 0 : i64, scratch_operands = 0 : i64, tpu.core_type = #tpu.core_type<tc>, window_params = [{transform_indices = @transform_0, window_bounds = array<i64: 1024, 128>}, {pipeline_mode = #tpu.pipeline_mode<synchronous>, transform_indices = @transform_1, window_bounds = array<i64: 1, 128>}, {pipeline_mode = #tpu.pipeline_mode<synchronous>, transform_indices = @transform_2, window_bounds = array<i64: 1, 128>}, {transform_indices = @transform_3, window_bounds = array<i64: 1024, 128>}, {transform_indices = @transform_4, window_bounds = array<i64: 1024, 128>}]} {
    %c0 = arith.constant 0 : index
    %c0_0 = arith.constant 0 : index
    %0 = vector.load %arg1[%c0, %c0_0] : memref<1024x128xf32, #tpu.memory_space<vmem>>, vector<1024x128xf32>
    %c0_1 = arith.constant 0 : index
    %c0_2 = arith.constant 0 : index
    %1 = vector.load %arg2[%c0_1, %c0_2] : memref<1x128xf32, #tpu.memory_space<vmem>>, vector<1x128xf32>
    %2 = vector.broadcast %1 : vector<1x128xf32> to vector<1024x128xf32>
    %3 = arith.mulf %0, %2 : vector<1024x128xf32>
    %c0_3 = arith.constant 0 : index
    %c0_4 = arith.constant 0 : index
    %4 = vector.load %arg3[%c0_3, %c0_4] : memref<1x128xf32, #tpu.memory_space<vmem>>, vector<1x128xf32>
    %5 = vector.broadcast %4 : vector<1x128xf32> to vector<1024x128xf32>
    %6 = arith.addf %3, %5 : vector<1024x128xf32>
    %c0_5 = arith.constant 0 : index
    %c0_6 = arith.constant 0 : index
    %7 = vector.load %arg4[%c0_5, %c0_6] : memref<1024x128xf32, #tpu.memory_space<vmem>>, vector<1024x128xf32>
    %8 = arith.addf %6, %7 : vector<1024x128xf32>
    %cst = arith.constant 0.000000e+00 : f32
    %9 = vector.broadcast %cst : f32 to vector<1024x128xf32>
    %10 = arith.maximumf %8, %9 : vector<1024x128xf32>
    %c0_7 = arith.constant 0 : index
    %c0_8 = arith.constant 0 : index
    %11 = vector.load %arg5[%c0_7, %c0_8] : memref<1024x128xf32, #tpu.memory_space<vmem>>, vector<1024x128xf32>
    tpu.vector_store %arg5[%c0_7, %c0_8], %10 {strides = array<i32>} : memref<1024x128xf32, #tpu.memory_space<vmem>>, vector<1024x128xf32>,
    return
  }
  func.func @transform_0(%arg0: i32) -> (i32, i32) {
    %c0_i32 = arith.constant 0 : i32
    %c0_i32_0 = arith.constant 0 : i32
    return %arg0, %c0_i32 : i32, i32
  }
  func.func @transform_1(%arg0: i32) -> (i32, i32) {
    %c0_i32 = arith.constant 0 : i32
    %c0_i32_0 = arith.constant 0 : i32
    %c0_i32_1 = arith.constant 0 : i32
    return %c0_i32, %c0_i32_0 : i32, i32
  }
  func.func @transform_2(%arg0: i32) -> (i32, i32) {
    %c0_i32 = arith.constant 0 : i32
    %c0_i32_0 = arith.constant 0 : i32
    %c0_i32_1 = arith.constant 0 : i32
    return %c0_i32, %c0_i32_0 : i32, i32
  }
  func.func @transform_3(%arg0: i32) -> (i32, i32) {
    %c0_i32 = arith.constant 0 : i32
    %c0_i32_0 = arith.constant 0 : i32
    return %arg0, %c0_i32 : i32, i32
  }
  func.func @transform_4(%arg0: i32) -> (i32, i32) {
    %c0_i32 = arith.constant 0 : i32
    %c0_i32_0 = arith.constant 0 : i32
    return %arg0, %c0_i32 : i32, i32
  }
}

</mosaic_0001>

<bundles_post_ra>
// kernel: conv3d_forward.2
= control target key start
LH: loop header
LB: loop body
LE: loop exit
PB: predicated region body
PF: predicated region fallthrough
CT: control target
= control target key end

     0   :  { %s2351_s12 = smov 0   ;;  %s2984_s0 = inlined_call_operand.vmem [shape: bf16[4096,128], index: 0, kind: input, shape index: {}]   ;;  %s2985_s1 = inlined_call_operand.vmem [shape: bf16[128,128], index: 1, kind: input, shape index: {}]   ;;  %s2986_s2 = inlined_call_operand.vmem [shape: f32[4096,128], index: 2, kind: output, shape index: {0}]   ;;  %s2987_s3 = inlined_call_operand.vmem [shape: f32[32,128], index: 3, kind: output, shape index: {1}]  }
   0x1 LB: > { %s2357_s13 = sadd.s32 4294967295, %s2329_s12   ;;  %p1931_p0 = scmp.ge.s32.totalorder %s2329_s12, 1  ;;  %s2329_s12 = sphi %s2351_s12, %s14_s12  }
   0x2   : > { %p141_p1 = scmp.lt.s32.totalorder %s2329_s12, 5 }
   0x4   : > { %p142_p2 = pnand %p1931_p0, %p141_p1 }
   0x6   : > { %145 = sbr.rel (%p142_p2) target bundleno = 532 (0x214), region = 28 }
   0xd   : > { %v2251_v0 = vld [vmem:[%s2985_s1] sm:$0xff]   ;;  %s1932_s16 = sshll.u32 %s2357_s13, 7  ;;  %v2252_v1 = vld [vmem:[%s2985_s1 + $0x8] sm:$0xff]   ;;  %v2253_v2 = vld [vmem:[%s2985_s1 + $0x10] sm:$0xff]   ;;  %p181_p4 = scmp.lt.s32.totalorder %s2357_s13, 3 }
   0xe   : > { %p170_p3 = scmp.lt.s32.totalorder %s1932_s16, 511  ;;  %2083 = vmatprep.subr.bf16.mxu0 %v2251_v0  ;;  %2227 = vmatprep.subr.bf16.mxu1 %v2251_v0  ;;  %v2254_v3 = vld [vmem:[%s2985_s1 + $0x18] sm:$0xff]   ;;  %v2255_v5 = vld [vmem:[%s2985_s1 + $0x20] sm:$0xff]   ;;  %v2256_v6 = vld [vmem:[%s2985_s1 + $0x28] sm:$0xff]  }
   0xf   : > { %2084 = vmatpush3.bf16.msra.mxu0 %v2251_v0  ;;  %2235 = vmatpush3.bf16.msra.mxu1 %v2251_v0  ;;  %v2257_v7 = vld [vmem:[%s2985_s1 + $0x30] sm:$0xff]   ;;  %v2258_v8 = vld [vmem:[%s2985_s1 + $0x38] sm:$0xff]   ;;  %s3043_s13 = smov (!%p181_p4, %s2357_s13), 3 }
  0x10   : > { %s3041_s16 = smov (!%p170_p3, %s1932_s16), 511  ;;  %2085 = vmatprep.subr.bf16.mxu0 %v2252_v1  ;;  %2228 = vmatprep.subr.bf16.mxu1 %v2252_v1  ;;  %s1936_s14 = sshll.u32 %s3043_s13, 3 }
  0x11   : > { %s1933_s21 = sshll.u32 %s3041_s16, 2  ;;  %s1935_s8 = sshll.u32 %s3041_s16, 3 }
  0x12   : > { %s2377_s24 = scalar_lea.vmem %s2984_s0, %s1933_s21  ;;  %s2462_s11 = scalar_lea.vmem %s2986_s2, %s1935_s8 }
  0x13   : > { %2086 = vmatpush3.bf16.msra.mxu0 %v2252_v1  ;;  %2236 = vmatpush3.bf16.msra.mxu1 %v2252_v1  ;;  %v2259_v4 = vld [vmem:[%s2377_s24] sm:$0xff]   ;;  %v2260_v9 = vld [vmem:[%s2377_s24 + $0x8] sm:$0xff]   ;;  %v2261_v10 = vld [vmem:[%s2377_s24 + $0x10] sm:$0xff]   ;;  %s184_s17 = scalar_lea.vmem %s2987_s3, %s1936_s14 }
  0x14   : > { %2087 = vmatprep.subr.bf16.mxu0 %v2253_v2  ;;  %2229 = vmatprep.subr.bf16.mxu1 %v2253_v2  ;;  %v2262_v11 = vld [vmem:[%s2377_s24 + $0x18] sm:$0xff]   ;;  %v2263_v12 = vld [vmem:[%s2377_s24 + $0x20] sm:$0xff]   ;;  %v2292_v14 = vld [vmem:[%s2377_s24 + $0x108] sm:$0xff]  }
  0x15   : > { %2099 = vmatprep.mubr.bf16.mxu0 %v2259_v4  ;;  %v2291_v13 = vld [vmem:[%s2377_s24 + $0x100] sm:$0xff]   ;;  %v2293_v15 = vld [vmem:[%s2377_s24 + $0x110] sm:$0xff]   ;;  %v2264_v16 = vld [vmem:[%s2377_s24 + $0x28] sm:$0xff]  }
  0x16   : > { %2163 = vmatprep.mubr.bf16.mxu1 %v2291_v13  ;;  %v2265_v17 = vld [vmem:[%s2377_s24 + $0x30] sm:$0xff]   ;;  %v2294_v18 = vld [vmem:[%s2377_s24 + $0x118] sm:$0xff]   ;;  %v2295_v19 = vld [vmem:[%s2377_s24 + $0x120] sm:$0xff]  }
  0x17   : > { %2088 = vmatpush3.bf16.msra.mxu0 %v2253_v2  ;;  %2237 = vmatpush3.bf16.msra.mxu1 %v2253_v2  ;;  %v2266_v20 = vld [vmem:[%s2377_s24 + $0x38] sm:$0xff]   ;;  %v2267_v21 = vld [vmem:[%s2377_s24 + $0x40] sm:$0xff]   ;;  %v2296_v22 = vld [vmem:[%s2377_s24 + $0x128] sm:$0xff]  }
  0x18   : > { %2089 = vmatprep.subr.bf16.mxu0 %v2254_v3  ;;  %2230 = vmatprep.subr.bf16.mxu1 %v2254_v3  ;;  %v2297_v23 = vld [vmem:[%s2377_s24 + $0x130] sm:$0xff]   ;;  %v2268_v24 = vld [vmem:[%s2377_s24 + $0x48] sm:$0xff]   ;;  %v2298_v26 = vld [vmem:[%s2377_s24 + $0x138] sm:$0xff]  }
  0x19   : > { %v2269_v25 = vld [vmem:[%s2377_s24 + $0x50] sm:$0xff]   ;;  %v2299_v27 = vld [vmem:[%s2377_s24 + $0x140] sm:$0xff]   ;;  %v2270_v28 = vld [vmem:[%s2377_s24 + $0x58] sm:$0xff]  }
  0x1a   : > { %v2271_v29 = vld [vmem:[%s2377_s24 + $0x60] sm:$0xff]   ;;  %v2300_v30 = vld [vmem:[%s2377_s24 + $0x148] sm:$0xff]   ;;  %v2301_v31 = vld [vmem:[%s2377_s24 + $0x150] sm:$0xff]  }
  0x1b   : > { %2090 = vmatpush3.bf16.msra.mxu0 %v2254_v3  ;;  %2238 = vmatpush3.bf16.msra.mxu1 %v2254_v3  ;;  %v2272_v32 = vld [vmem:[%s2377_s24 + $0x68] sm:$0xff]   ;;  %v2273_v33 = vld [vmem:[%s2377_s24 + $0x70] sm:$0xff]   ;;  %v2302_v34 = vld [vmem:[%s2377_s24 + $0x158] sm:$0xff]  }
  0x1c   : > { %2091 = vmatprep.subr.bf16.mxu0 %v2255_v5  ;;  %2231 = vmatprep.subr.bf16.mxu1 %v2255_v5  ;;  %v2303_v35 = vld [vmem:[%s2377_s24 + $0x160] sm:$0xff]   ;;  %v2274_v36 = vld [vmem:[%s2377_s24 + $0x78] sm:$0xff]   ;;  %v2304_v38 = vld [vmem:[%s2377_s24 + $0x168] sm:$0xff]  }
  0x1d   : > { %v2275_v37 = vld [vmem:[%s2377_s24 + $0x80] sm:$0xff]   ;;  %v2305_v39 = vld [vmem:[%s2377_s24 + $0x170] sm:$0xff]   ;;  %v2276_v40 = vld [vmem:[%s2377_s24 + $0x88] sm:$0xff]  }
  0x1e   : > { %v2277_v41 = vld [vmem:[%s2377_s24 + $0x90] sm:$0xff]   ;;  %v2306_v42 = vld [vmem:[%s2377_s24 + $0x178] sm:$0xff]   ;;  %v2307_v43 = vld [vmem:[%s2377_s24 + $0x180] sm:$0xff]  }
  0x1f   : > { %2092 = vmatpush3.bf16.msra.mxu0 %v2255_v5  ;;  %2239 = vmatpush3.bf16.msra.mxu1 %v2255_v5  ;;  %v2278_v44 = vld [vmem:[%s2377_s24 + $0x98] sm:$0xff]   ;;  %v2279_v45 = vld [vmem:[%s2377_s24 + $0xa0] sm:$0xff]   ;;  %v2308_v46 = vld [vmem:[%s2377_s24 + $0x188] sm:$0xff]  }
  0x20   : > { %2093 = vmatprep.subr.bf16.mxu0 %v2256_v6  ;;  %2232 = vmatprep.subr.bf16.mxu1 %v2256_v6  ;;  %v2309_v47 = vld [vmem:[%s2377_s24 + $0x190] sm:$0xff]   ;;  %v2280_v48 = vld [vmem:[%s2377_s24 + $0xa8] sm:$0xff]   ;;  %v2310_v50 = vld [vmem:[%s2377_s24 + $0x198] sm:$0xff]  }
  0x21   : > { %v2281_v49 = vld [vmem:[%s2377_s24 + $0xb0] sm:$0xff]   ;;  %v2311_v51 = vld [vmem:[%s2377_s24 + $0x1a0] sm:$0xff]   ;;  %v2282_v52 = vld [vmem:[%s2377_s24 + $0xb8] sm:$0xff]  }
  0x22   : > { %v2283_v53 = vld [vmem:[%s2377_s24 + $0xc0] sm:$0xff]   ;;  %v2312_v54 = vld [vmem:[%s2377_s24 + $0x1a8] sm:$0xff]   ;;  %v2313_v55 = vld [vmem:[%s2377_s24 + $0x1b0] sm:$0xff]  }
  0x23   : > { %2094 = vmatpush3.bf16.msra.mxu0 %v2256_v6  ;;  %2240 = vmatpush3.bf16.msra.mxu1 %v2256_v6  ;;  %v2284_v56 = vld [vmem:[%s2377_s24 + $0xc8] sm:$0xff]   ;;  %v2285_v57 = vld [vmem:[%s2377_s24 + $0xd0] sm:$0xff]   ;;  %v2314_v58 = vld [vmem:[%s2377_s24 + $0x1b8] sm:$0xff]  }
  0x24   : > { %2095 = vmatprep.subr.bf16.mxu0 %v2257_v7  ;;  %2233 = vmatprep.subr.bf16.mxu1 %v2257_v7  ;;  %v2315_v59 = vld [vmem:[%s2377_s24 + $0x1c0] sm:$0xff]   ;;  %v2286_v60 = vld [vmem:[%s2377_s24 + $0xd8] sm:$0xff]   ;;  %v2316_v62 = vld [vmem:[%s2377_s24 + $0x1c8] sm:$0xff]  }
  0x25   : > { %v2287_v61 = vld [vmem:[%s2377_s24 + $0xe0] sm:$0xff]   ;;  %v2317_v63 = vld [vmem:[%s2377_s24 + $0x1d0] sm:$0xff]   ;;  %v2288_v0 = vld [vmem:[%s2377_s24 + $0xe8] sm:$0xff]  }
  0x26   : > { %v2289_v1 = vld [vmem:[%s2377_s24 + $0xf0] sm:$0xff]   ;;  %v2318_v2 = vld [vmem:[%s2377_s24 + $0x1d8] sm:$0xff]   ;;  %v2319_v3 = vld [vmem:[%s2377_s24 + $0x1e0] sm:$0xff]  }
  0x27   : > { %2096 = vmatpush3.bf16.msra.mxu0 %v2257_v7  ;;  %2241 = vmatpush3.bf16.msra.mxu1 %v2257_v7  ;;  %v2290_v4 = vld [vmem:[%s2377_s24 + $0xf8] sm:$0xff]   ;;  %v2320_v5 = vld [vmem:[%s2377_s24 + $0x1e8] sm:$0xff]   ;;  %v2321_v6 = vld [vmem:[%s2377_s24 + $0x1f0] sm:$0xff]  }
  0x28   : > { %2097 = vmatprep.subr.bf16.mxu0 %v2258_v8  ;;  %2234 = vmatprep.subr.bf16.mxu1 %v2258_v8  ;;  %v2322_v7 = vld [vmem:[%s2377_s24 + $0x1f8] sm:$0xff]  }
  0x2b   : > { %2098 = vmatpush3.bf16.msra.mxu0 %v2258_v8  ;;  %2242 = vmatpush3.bf16.msra.mxu1 %v2258_v8 }
  0x2e   : > { %2100 = vmatmul.mubr.bf16.vlgmr.msra.gmra.mrb[0].mxu0 %v2260_v9  ;;  %2164 = vmatmul.mubr.bf16.vlgmr.msra.gmra.mrb[0].mxu1 %v2292_v14 }
  0x2f   : > { %2103 = vmatprep.mubr.bf16.mxu0 %v2261_v10  ;;  %2167 = vmatprep.mubr.bf16.mxu1 %v2293_v15 }
  0x36   : > { %2104 = vmatmul.mubr.bf16.gmra.mrb[4].mxu0 %v2262_v11  ;;  %2168 = vmatmul.mubr.bf16.gmra.mrb[4].mxu1 %v2294_v18 }
  0x37   : > { %2107 = vmatprep.mubr.bf16.mxu0 %v2263_v12  ;;  %2171 = vmatprep.mubr.bf16.mxu1 %v2295_v19 }
  0x3e   : > { %2108 = vmatmul.mubr.bf16.gmra.mrb[8].mxu0 %v2264_v16  ;;  %2172 = vmatmul.mubr.bf16.gmra.mrb[8].mxu1 %v2296_v22 }
  0x3f   : > { %2111 = vmatprep.mubr.bf16.mxu0 %v2265_v17  ;;  %2175 = vmatprep.mubr.bf16.mxu1 %v2297_v23 }
  0x46   : > { %2112 = vmatmul.mubr.bf16.gmra.mrb[12].mxu0 %v2266_v20  ;;  %2176 = vmatmul.mubr.bf16.gmra.mrb[12].mxu1 %v2298_v26 }
  0x47   : > { %2115 = vmatprep.mubr.bf16.mxu0 %v2267_v21  ;;  %2179 = vmatprep.mubr.bf16.mxu1 %v2299_v27 }
  0x4e   : > { %2116 = vmatmul.mubr.bf16.gmra.mrb[16].mxu0 %v2268_v24  ;;  %2180 = vmatmul.mubr.bf16.gmra.mrb[16].mxu1 %v2300_v30 }
  0x4f   : > { %2119 = vmatprep.mubr.bf16.mxu0 %v2269_v25  ;;  %2183 = vmatprep.mubr.bf16.mxu1 %v2301_v31 }
  0x56   : > { %2120 = vmatmul.mubr.bf16.gmra.mrb[20].mxu0 %v2270_v28  ;;  %2184 = vmatmul.mubr.bf16.gmra.mrb[20].mxu1 %v2302_v34 }
  0x57   : > { %2123 = vmatprep.mubr.bf16.mxu0 %v2271_v29  ;;  %2187 = vmatprep.mubr.bf16.mxu1 %v2303_v35 }
  0x5e   : > { %2124 = vmatmul.mubr.bf16.gmra.mrb[24].mxu0 %v2272_v32  ;;  %2188 = vmatmul.mubr.bf16.gmra.mrb[24].mxu1 %v2304_v38 }
  0x5f   : > { %2127 = vmatprep.mubr.bf16.mxu0 %v2273_v33  ;;  %2191 = vmatprep.mubr.bf16.mxu1 %v2305_v39 }
  0x66   : > { %2128 = vmatmul.mubr.bf16.gmra.mrb[28].mxu0 %v2274_v36  ;;  %2192 = vmatmul.mubr.bf16.gmra.mrb[28].mxu1 %v2306_v42 }
  0x67   : > { %2131 = vmatprep.mubr.bf16.mxu0 %v2275_v37  ;;  %2195 = vmatprep.mubr.bf16.mxu1 %v2307_v43 }
  0x6e   : > { %2132 = vmatmul.mubr.bf16.gmra.mrb[32].mxu0 %v2276_v40  ;;  %2196 = vmatmul.mubr.bf16.gmra.mrb[32].mxu1 %v2308_v46 }
  0x6f   : > { %2135 = vmatprep.mubr.bf16.mxu0 %v2277_v41  ;;  %2199 = vmatprep.mubr.bf16.mxu1 %v2309_v47 }
  0x76   : > { %2136 = vmatmul.mubr.bf16.gmra.mrb[36].mxu0 %v2278_v44  ;;  %2200 = vmatmul.mubr.bf16.gmra.mrb[36].mxu1 %v2310_v50 }
  0x77   : > { %2139 = vmatprep.mubr.bf16.mxu0 %v2279_v45  ;;  %2203 = vmatprep.mubr.bf16.mxu1 %v2311_v51 }
  0x7e   : > { %2140 = vmatmul.mubr.bf16.gmra.mrb[40].mxu0 %v2280_v48  ;;  %2204 = vmatmul.mubr.bf16.gmra.mrb[40].mxu1 %v2312_v54 }
  0x7f   : > { %2143 = vmatprep.mubr.bf16.mxu0 %v2281_v49  ;;  %2207 = vmatprep.mubr.bf16.mxu1 %v2313_v55 }
  0x86   : > { %2144 = vmatmul.mubr.bf16.gmra.mrb[44].mxu0 %v2282_v52  ;;  %2208 = vmatmul.mubr.bf16.gmra.mrb[44].mxu1 %v2314_v58 }
  0x87   : > { %2147 = vmatprep.mubr.bf16.mxu0 %v2283_v53  ;;  %2211 = vmatprep.mubr.bf16.mxu1 %v2315_v59 }
  0x8e   : > { %2148 = vmatmul.mubr.bf16.gmra.mrb[48].mxu0 %v2284_v56  ;;  %2212 = vmatmul.mubr.bf16.gmra.mrb[48].mxu1 %v2316_v62 }
  0x8f   : > { %2151 = vmatprep.mubr.bf16.mxu0 %v2285_v57  ;;  %2215 = vmatprep.mubr.bf16.mxu1 %v2317_v63 }
  0x96   : > { %2152 = vmatmul.mubr.bf16.gmra.mrb[52].mxu0 %v2286_v60  ;;  %2216 = vmatmul.mubr.bf16.gmra.mrb[52].mxu1 %v2318_v2 }
  0x97   : > { %2155 = vmatprep.mubr.bf16.mxu0 %v2287_v61  ;;  %2219 = vmatprep.mubr.bf16.mxu1 %v2319_v3 }
  0x9e   : > { %2156 = vmatmul.mubr.bf16.gmra.mrb[56].mxu0 %v2288_v0  ;;  %2220 = vmatmul.mubr.bf16.gmra.mrb[56].mxu1 %v2320_v5 }
  0x9f   : > { %2159 = vmatprep.mubr.bf16.mxu0 %v2289_v1  ;;  %2223 = vmatprep.mubr.bf16.mxu1 %v2321_v6 }
  0xa6   : > { %2160 = vmatmul.mubr.bf16.gmra.mrb[60].mxu0 %v2290_v4  ;;  %2224 = vmatmul.mubr.bf16.gmra.mrb[60].mxu1 %v2322_v7 }
 0x101   : > { %v2101_v8 = vpop.f32.mrb[0].mxu0  ;;  %v2469_v23 = vpop.f32.mrb[0].mxu1 }
 0x102   : > { %1309 = vst [vmem:[%s2462_s11 + $0x10] sm:$0xff] %v2101_v8  ;;  %v796_v9 = vpop.f32.mrb[1].mxu0  ;;  %v1570_v15 = vmul.f32 %v2101_v8, %v2101_v8  ;;  %1373 = vst [vmem:[%s2462_s11 + $0x210] sm:$0xff] %v2469_v23  ;;  %v2474_v28 = vpop.f32.mrb[1].mxu1 }
 0x103   : > { %1307 = vst [vmem:[%s2462_s11] sm:$0xff] %v796_v9  ;;  %v2102_v10 = vpop.f32.mrb[2].mxu0  ;;  %v1568_v12 = vmul.f32 %v796_v9, %v796_v9  ;;  %1371 = vst [vmem:[%s2462_s11 + $0x200] sm:$0xff] %v2474_v28  ;;  %v2479_v30 = vpop.f32.mrb[2].mxu1 }
 0x104   : > { %1310 = vst [vmem:[%s2462_s11 + $0x18] sm:$0xff] %v2102_v10  ;;  %v799_v11 = vpop.f32.mrb[3].mxu0  ;;  %v1571_v18 = vmul.f32 %v2102_v10, %v2102_v10  ;;  %1374 = vst [vmem:[%s2462_s11 + $0x218] sm:$0xff] %v2479_v30  ;;  %v2484_v34 = vpop.f32.mrb[3].mxu1 }
 0x105   : > { %1308 = vst [vmem:[%s2462_s11 + $0x8] sm:$0xff] %v799_v11  ;;  %v1435_v13 = vadd.f32 %v799_v11, %v796_v9  ;;  %v1569_v14 = vmul.f32 %v799_v11, %v799_v11  ;;  %1372 = vst [vmem:[%s2462_s11 + $0x208] sm:$0xff] %v2484_v34 }
 0x107   : > { %v1436_v16 = vadd.f32 %v2101_v8, %v1435_v13  ;;  %v1696_v17 = vadd.f32 %v1569_v14, %v1568_v12 }
 0x109   : > { %v1697_v19 = vadd.f32 %v1696_v17, %v1570_v15  ;;  %v2105_v20 = vpop.f32.mrb[4].mxu0  ;;  %v1437_v21 = vadd.f32 %v2102_v10, %v1436_v16  ;;  %v2489_v43 = vpop.f32.mrb[4].mxu1 }
 0x10a   : > { %1313 = vst [vmem:[%s2462_s11 + $0x30] sm:$0xff] %v2105_v20  ;;  %v812_v22 = vpop.f32.mrb[5].mxu0  ;;  %v1574_v35 = vmul.f32 %v2105_v20, %v2105_v20  ;;  %1377 = vst [vmem:[%s2462_s11 + $0x230] sm:$0xff] %v2489_v43  ;;  %v2494_v48 = vpop.f32.mrb[5].mxu1 }
 0x10b   : > { %1311 = vst [vmem:[%s2462_s11 + $0x20] sm:$0xff] %v812_v22  ;;  %v1438_v24 = vadd.f32 %v1437_v21, %v812_v22  ;;  %v1572_v25 = vmul.f32 %v812_v22, %v812_v22  ;;  %v1698_v26 = vadd.f32 %v1697_v19, %v1571_v18  ;;  %v2106_v27 = vpop.f32.mrb[6].mxu0  ;;  %1375 = vst [vmem:[%s2462_s11 + $0x220] sm:$0xff] %v2494_v48  ;;  %v2499_v50 = vpop.f32.mrb[6].mxu1 }
 0x10c   : > { %1314 = vst [vmem:[%s2462_s11 + $0x38] sm:$0xff] %v2106_v27  ;;  %v815_v29 = vpop.f32.mrb[7].mxu0  ;;  %v1575_v38 = vmul.f32 %v2106_v27, %v2106_v27  ;;  %1378 = vst [vmem:[%s2462_s11 + $0x238] sm:$0xff] %v2499_v50  ;;  %v2504_v54 = vpop.f32.mrb[7].mxu1 }
 0x10d   : > { %v1699_v31 = vadd.f32 %v1698_v26, %v1572_v25  ;;  %1312 = vst [vmem:[%s2462_s11 + $0x28] sm:$0xff] %v815_v29  ;;  %v1439_v32 = vadd.f32 %v1438_v24, %v815_v29  ;;  %v1573_v33 = vmul.f32 %v815_v29, %v815_v29  ;;  %1376 = vst [vmem:[%s2462_s11 + $0x228] sm:$0xff] %v2504_v54 }
 0x10f   : > { %v1440_v36 = vadd.f32 %v2105_v20, %v1439_v32  ;;  %v1700_v37 = vadd.f32 %v1699_v31, %v1573_v33 }
 0x111   : > { %v1701_v39 = vadd.f32 %v1700_v37, %v1574_v35  ;;  %v2109_v40 = vpop.f32.mrb[8].mxu0  ;;  %v1441_v41 = vadd.f32 %v2106_v27, %v1440_v36  ;;  %v2509_v63 = vpop.f32.mrb[8].mxu1 }
 0x112   : > { %1317 = vst [vmem:[%s2462_s11 + $0x50] sm:$0xff] %v2109_v40  ;;  %v828_v42 = vpop.f32.mrb[9].mxu0  ;;  %v1578_v55 = vmul.f32 %v2109_v40, %v2109_v40  ;;  %1381 = vst [vmem:[%s2462_s11 + $0x250] sm:$0xff] %v2509_v63  ;;  %v2514_v4 = vpop.f32.mrb[9].mxu1 }
 0x113   : > { %1315 = vst [vmem:[%s2462_s11 + $0x40] sm:$0xff] %v828_v42  ;;  %v1442_v44 = vadd.f32 %v1441_v41, %v828_v42  ;;  %v1576_v45 = vmul.f32 %v828_v42, %v828_v42  ;;  %v1702_v46 = vadd.f32 %v1701_v39, %v1575_v38  ;;  %v2110_v47 = vpop.f32.mrb[10].mxu0  ;;  %1379 = vst [vmem:[%s2462_s11 + $0x240] sm:$0xff] %v2514_v4  ;;  %v2519_v6 = vpop.f32.mrb[10].mxu1 }
 0x114   : > { %1318 = vst [vmem:[%s2462_s11 + $0x58] sm:$0xff] %v2110_v47  ;;  %v831_v49 = vpop.f32.mrb[11].mxu0  ;;  %v1579_v58 = vmul.f32 %v2110_v47, %v2110_v47  ;;  %1382 = vst [vmem:[%s2462_s11 + $0x258] sm:$0xff] %v2519_v6  ;;  %v2524_v10 = vpop.f32.mrb[11].mxu1 }
 0x115   : > { %v1703_v51 = vadd.f32 %v1702_v46, %v1576_v45  ;;  %1316 = vst [vmem:[%s2462_s11 + $0x48] sm:$0xff] %v831_v49  ;;  %v1443_v52 = vadd.f32 %v1442_v44, %v831_v49  ;;  %v1577_v53 = vmul.f32 %v831_v49, %v831_v49  ;;  %1380 = vst [vmem:[%s2462_s11 + $0x248] sm:$0xff] %v2524_v10 }
 0x117   : > { %v1444_v56 = vadd.f32 %v2109_v40, %v1443_v52  ;;  %v1704_v57 = vadd.f32 %v1703_v51, %v1577_v53 }
 0x119   : > { %v1705_v59 = vadd.f32 %v1704_v57, %v1578_v55  ;;  %v2113_v60 = vpop.f32.mrb[12].mxu0  ;;  %v1445_v61 = vadd.f32 %v2110_v47, %v1444_v56  ;;  %v2529_v19 = vpop.f32.mrb[12].mxu1 }
 0x11a   : > { %1321 = vst [vmem:[%s2462_s11 + $0x70] sm:$0xff] %v2113_v60  ;;  %v844_v62 = vpop.f32.mrb[13].mxu0  ;;  %v1582_v11 = vmul.f32 %v2113_v60, %v2113_v60  ;;  %1385 = vst [vmem:[%s2462_s11 + $0x270] sm:$0xff] %v2529_v19  ;;  %v2534_v25 = vpop.f32.mrb[13].mxu1 }
 0x11b   : > { %1319 = vst [vmem:[%s2462_s11 + $0x60] sm:$0xff] %v844_v62  ;;  %v1446_v0 = vadd.f32 %v1445_v61, %v844_v62  ;;  %v1580_v1 = vmul.f32 %v844_v62, %v844_v62  ;;  %v1706_v2 = vadd.f32 %v1705_v59, %v1579_v58  ;;  %v2114_v3 = vpop.f32.mrb[14].mxu0  ;;  %1383 = vst [vmem:[%s2462_s11 + $0x260] sm:$0xff] %v2534_v25  ;;  %v2539_v27 = vpop.f32.mrb[14].mxu1 }
 0x11c   : > { %1322 = vst [vmem:[%s2462_s11 + $0x78] sm:$0xff] %v2114_v3  ;;  %v847_v5 = vpop.f32.mrb[15].mxu0  ;;  %v1583_v14 = vmul.f32 %v2114_v3, %v2114_v3  ;;  %1386 = vst [vmem:[%s2462_s11 + $0x278] sm:$0xff] %v2539_v27  ;;  %v2544_v33 = vpop.f32.mrb[15].mxu1 }
 0x11d   : > { %v1707_v7 = vadd.f32 %v1706_v2, %v1580_v1  ;;  %1320 = vst [vmem:[%s2462_s11 + $0x68] sm:$0xff] %v847_v5  ;;  %v1447_v8 = vadd.f32 %v1446_v0, %v847_v5  ;;  %v1581_v9 = vmul.f32 %v847_v5, %v847_v5  ;;  %1384 = vst [vmem:[%s2462_s11 + $0x268] sm:$0xff] %v2544_v33 }
 0x11f   : > { %v1448_v12 = vadd.f32 %v2113_v60, %v1447_v8  ;;  %v1708_v13 = vadd.f32 %v1707_v7, %v1581_v9 }
 0x121   : > { %v1709_v15 = vadd.f32 %v1708_v13, %v1582_v11  ;;  %v2117_v16 = vpop.f32.mrb[16].mxu0  ;;  %v1449_v17 = vadd.f32 %v2114_v3, %v1448_v12  ;;  %v2549_v44 = vpop.f32.mrb[16].mxu1 }
 0x122   : > { %1325 = vst [vmem:[%s2462_s11 + $0x90] sm:$0xff] %v2117_v16  ;;  %v860_v18 = vpop.f32.mrb[17].mxu0  ;;  %v1586_v35 = vmul.f32 %v2117_v16, %v2117_v16  ;;  %1389 = vst [vmem:[%s2462_s11 + $0x290] sm:$0xff] %v2549_v44  ;;  %v2554_v51 = vpop.f32.mrb[17].mxu1 }
 0x123   : > { %1323 = vst [vmem:[%s2462_s11 + $0x80] sm:$0xff] %v860_v18  ;;  %v1450_v20 = vadd.f32 %v1449_v17, %v860_v18  ;;  %v1584_v21 = vmul.f32 %v860_v18, %v860_v18  ;;  %v1710_v22 = vadd.f32 %v1709_v15, %v1583_v14  ;;  %v2118_v24 = vpop.f32.mrb[18].mxu0  ;;  %1387 = vst [vmem:[%s2462_s11 + $0x280] sm:$0xff] %v2554_v51  ;;  %v2559_v53 = vpop.f32.mrb[18].mxu1 }
 0x124   : > { %1326 = vst [vmem:[%s2462_s11 + $0x98] sm:$0xff] %v2118_v24  ;;  %v863_v26 = vpop.f32.mrb[19].mxu0  ;;  %v1587_v38 = vmul.f32 %v2118_v24, %v2118_v24  ;;  %1390 = vst [vmem:[%s2462_s11 + $0x298] sm:$0xff] %v2559_v53  ;;  %v2564_v58 = vpop.f32.mrb[19].mxu1 }
 0x125   : > { %v1711_v29 = vadd.f32 %v1710_v22, %v1584_v21  ;;  %1324 = vst [vmem:[%s2462_s11 + $0x88] sm:$0xff] %v863_v26  ;;  %v1451_v31 = vadd.f32 %v1450_v20, %v863_v26  ;;  %v1585_v32 = vmul.f32 %v863_v26, %v863_v26  ;;  %1388 = vst [vmem:[%s2462_s11 + $0x288] sm:$0xff] %v2564_v58 }
 0x127   : > { %v1452_v36 = vadd.f32 %v2117_v16, %v1451_v31  ;;  %v1712_v37 = vadd.f32 %v1711_v29, %v1585_v32 }
 0x129   : > { %v1713_v39 = vadd.f32 %v1712_v37, %v1586_v35  ;;  %v2121_v40 = vpop.f32.mrb[20].mxu0  ;;  %v1453_v41 = vadd.f32 %v2118_v24, %v1452_v36  ;;  %v2569_v5 = vpop.f32.mrb[20].mxu1 }
 0x12a   : > { %1329 = vst [vmem:[%s2462_s11 + $0xb0] sm:$0xff] %v2121_v40  ;;  %v876_v42 = vpop.f32.mrb[21].mxu0  ;;  %v1590_v59 = vmul.f32 %v2121_v40, %v2121_v40  ;;  %1393 = vst [vmem:[%s2462_s11 + $0x2b0] sm:$0xff] %v2569_v5  ;;  %v2574_v12 = vpop.f32.mrb[21].mxu1 }
 0x12b   : > { %1327 = vst [vmem:[%s2462_s11 + $0xa0] sm:$0xff] %v876_v42  ;;  %v1454_v45 = vadd.f32 %v1453_v41, %v876_v42  ;;  %v1588_v46 = vmul.f32 %v876_v42, %v876_v42  ;;  %v1714_v47 = vadd.f32 %v1713_v39, %v1587_v38  ;;  %v2122_v49 = vpop.f32.mrb[22].mxu0  ;;  %1391 = vst [vmem:[%s2462_s11 + $0x2a0] sm:$0xff] %v2574_v12  ;;  %v2579_v14 = vpop.f32.mrb[22].mxu1 }
 0x12c   : > { %1330 = vst [vmem:[%s2462_s11 + $0xb8] sm:$0xff] %v2122_v49  ;;  %v879_v52 = vpop.f32.mrb[23].mxu0  ;;  %v1591_v62 = vmul.f32 %v2122_v49, %v2122_v49  ;;  %1394 = vst [vmem:[%s2462_s11 + $0x2b8] sm:$0xff] %v2579_v14  ;;  %v2584_v18 = vpop.f32.mrb[23].mxu1 }
 0x12d   : > { %v1715_v55 = vadd.f32 %v1714_v47, %v1588_v46  ;;  %1328 = vst [vmem:[%s2462_s11 + $0xa8] sm:$0xff] %v879_v52  ;;  %v1455_v56 = vadd.f32 %v1454_v45, %v879_v52  ;;  %v1589_v57 = vmul.f32 %v879_v52, %v879_v52  ;;  %1392 = vst [vmem:[%s2462_s11 + $0x2a8] sm:$0xff] %v2584_v18 }
 0x12f   : > { %v1456_v60 = vadd.f32 %v2121_v40, %v1455_v56  ;;  %v1716_v61 = vadd.f32 %v1715_v55, %v1589_v57 }
 0x131   : > { %v1717_v0 = vadd.f32 %v1716_v61, %v1590_v59  ;;  %v2125_v1 = vpop.f32.mrb[24].mxu0  ;;  %v1457_v2 = vadd.f32 %v2122_v49, %v1456_v60  ;;  %v2589_v35 = vpop.f32.mrb[24].mxu1 }
 0x132   : > { %1333 = vst [vmem:[%s2462_s11 + $0xd0] sm:$0xff] %v2125_v1  ;;  %v892_v3 = vpop.f32.mrb[25].mxu0  ;;  %v1594_v20 = vmul.f32 %v2125_v1, %v2125_v1  ;;  %1397 = vst [vmem:[%s2462_s11 + $0x2d0] sm:$0xff] %v2589_v35  ;;  %v2594_v40 = vpop.f32.mrb[25].mxu1 }
 0x133   : > { %1331 = vst [vmem:[%s2462_s11 + $0xc0] sm:$0xff] %v892_v3  ;;  %v1458_v7 = vadd.f32 %v1457_v2, %v892_v3  ;;  %v1592_v8 = vmul.f32 %v892_v3, %v892_v3  ;;  %v1718_v9 = vadd.f32 %v1717_v0, %v1591_v62  ;;  %v2126_v11 = vpop.f32.mrb[26].mxu0  ;;  %1395 = vst [vmem:[%s2462_s11 + $0x2c0] sm:$0xff] %v2594_v40  ;;  %v2599_v42 = vpop.f32.mrb[26].mxu1 }
 0x134   : > { %1334 = vst [vmem:[%s2462_s11 + $0xd8] sm:$0xff] %v2126_v11  ;;  %v895_v13 = vpop.f32.mrb[27].mxu0  ;;  %v1595_v24 = vmul.f32 %v2126_v11, %v2126_v11  ;;  %1398 = vst [vmem:[%s2462_s11 + $0x2d8] sm:$0xff] %v2599_v42  ;;  %v2604_v49 = vpop.f32.mrb[27].mxu1 }
 0x135   : > { %v1719_v15 = vadd.f32 %v1718_v9, %v1592_v8  ;;  %1332 = vst [vmem:[%s2462_s11 + $0xc8] sm:$0xff] %v895_v13  ;;  %v1459_v16 = vadd.f32 %v1458_v7, %v895_v13  ;;  %v1593_v17 = vmul.f32 %v895_v13, %v895_v13  ;;  %1396 = vst [vmem:[%s2462_s11 + $0x2c8] sm:$0xff] %v2604_v49 }
 0x137   : > { %v1460_v21 = vadd.f32 %v2125_v1, %v1459_v16  ;;  %v1720_v22 = vadd.f32 %v1719_v15, %v1593_v17 }
 0x139   : > { %v1721_v26 = vadd.f32 %v1720_v22, %v1594_v20  ;;  %v2129_v29 = vpop.f32.mrb[28].mxu0  ;;  %v1461_v31 = vadd.f32 %v2126_v11, %v1460_v21  ;;  %v2609_v0 = vpop.f32.mrb[28].mxu1 }
 0x13a   : > { %1337 = vst [vmem:[%s2462_s11 + $0xf0] sm:$0xff] %v2129_v29  ;;  %v908_v32 = vpop.f32.mrb[29].mxu0  ;;  %v1598_v52 = vmul.f32 %v2129_v29, %v2129_v29  ;;  %1401 = vst [vmem:[%s2462_s11 + $0x2f0] sm:$0xff] %v2609_v0  ;;  %v2614_v8 = vpop.f32.mrb[29].mxu1 }
 0x13b   : > { %1335 = vst [vmem:[%s2462_s11 + $0xe0] sm:$0xff] %v908_v32  ;;  %v1462_v36 = vadd.f32 %v1461_v31, %v908_v32  ;;  %v1596_v37 = vmul.f32 %v908_v32, %v908_v32  ;;  %v1722_v38 = vadd.f32 %v1721_v26, %v1595_v24  ;;  %v2130_v39 = vpop.f32.mrb[30].mxu0  ;;  %1399 = vst [vmem:[%s2462_s11 + $0x2e0] sm:$0xff] %v2614_v8  ;;  %v2619_v11 = vpop.f32.mrb[30].mxu1 }
 0x13c   : > { %1338 = vst [vmem:[%s2462_s11 + $0xf8] sm:$0xff] %v2130_v39  ;;  %v911_v41 = vpop.f32.mrb[31].mxu0  ;;  %v1599_v57 = vmul.f32 %v2130_v39, %v2130_v39  ;;  %1402 = vst [vmem:[%s2462_s11 + $0x2f8] sm:$0xff] %v2619_v11  ;;  %v2624_v17 = vpop.f32.mrb[31].mxu1 }
 0x13d   : > { %v1723_v45 = vadd.f32 %v1722_v38, %v1596_v37  ;;  %1336 = vst [vmem:[%s2462_s11 + $0xe8] sm:$0xff] %v911_v41  ;;  %v1463_v46 = vadd.f32 %v1462_v36, %v911_v41  ;;  %v1597_v47 = vmul.f32 %v911_v41, %v911_v41  ;;  %1400 = vst [vmem:[%s2462_s11 + $0x2e8] sm:$0xff] %v2624_v17 }
 0x13f   : > { %v1464_v55 = vadd.f32 %v2129_v29, %v1463_v46  ;;  %v1724_v56 = vadd.f32 %v1723_v45, %v1597_v47 }
 0x141   : > { %v1725_v59 = vadd.f32 %v1724_v56, %v1598_v52  ;;  %v2133_v60 = vpop.f32.mrb[32].mxu0  ;;  %v1465_v61 = vadd.f32 %v2130_v39, %v1464_v55  ;;  %v2629_v36 = vpop.f32.mrb[32].mxu1 }
 0x142   : > { %1341 = vst [vmem:[%s2462_s11 + $0x110] sm:$0xff] %v2133_v60  ;;  %v924_v62 = vpop.f32.mrb[33].mxu0  ;;  %v1602_v20 = vmul.f32 %v2133_v60, %v2133_v60  ;;  %1405 = vst [vmem:[%s2462_s11 + $0x310] sm:$0xff] %v2629_v36  ;;  %v2634_v45 = vpop.f32.mrb[33].mxu1 }
 0x143   : > { %1339 = vst [vmem:[%s2462_s11 + $0x100] sm:$0xff] %v924_v62  ;;  %v1466_v1 = vadd.f32 %v1465_v61, %v924_v62  ;;  %v1600_v2 = vmul.f32 %v924_v62, %v924_v62  ;;  %v1726_v3 = vadd.f32 %v1725_v59, %v1599_v57  ;;  %v2134_v7 = vpop.f32.mrb[34].mxu0  ;;  %1403 = vst [vmem:[%s2462_s11 + $0x300] sm:$0xff] %v2634_v45  ;;  %v2639_v47 = vpop.f32.mrb[34].mxu1 }
 0x144   : > { %1342 = vst [vmem:[%s2462_s11 + $0x118] sm:$0xff] %v2134_v7  ;;  %v927_v9 = vpop.f32.mrb[35].mxu0  ;;  %v1603_v24 = vmul.f32 %v2134_v7, %v2134_v7  ;;  %1406 = vst [vmem:[%s2462_s11 + $0x318] sm:$0xff] %v2639_v47  ;;  %v2644_v57 = vpop.f32.mrb[35].mxu1 }
 0x145   : > { %v1727_v13 = vadd.f32 %v1726_v3, %v1600_v2  ;;  %1340 = vst [vmem:[%s2462_s11 + $0x108] sm:$0xff] %v927_v9  ;;  %v1467_v15 = vadd.f32 %v1466_v1, %v927_v9  ;;  %v1601_v16 = vmul.f32 %v927_v9, %v927_v9  ;;  %1404 = vst [vmem:[%s2462_s11 + $0x308] sm:$0xff] %v2644_v57 }
 0x147   : > { %v1468_v21 = vadd.f32 %v2133_v60, %v1467_v15  ;;  %v1728_v22 = vadd.f32 %v1727_v13, %v1601_v16 }
 0x149   : > { %v1729_v26 = vadd.f32 %v1728_v22, %v1602_v20  ;;  %v2137_v29 = vpop.f32.mrb[36].mxu0  ;;  %v1469_v31 = vadd.f32 %v2134_v7, %v1468_v21  ;;  %v2649_v9 = vpop.f32.mrb[36].mxu1 }
 0x14a   : > { %1345 = vst [vmem:[%s2462_s11 + $0x130] sm:$0xff] %v2137_v29  ;;  %v940_v32 = vpop.f32.mrb[37].mxu0  ;;  %v1606_v59 = vmul.f32 %v2137_v29, %v2137_v29  ;;  %1409 = vst [vmem:[%s2462_s11 + $0x330] sm:$0xff] %v2649_v9  ;;  %v2654_v21 = vpop.f32.mrb[37].mxu1 }
 0x14b   : > { %1343 = vst [vmem:[%s2462_s11 + $0x120] sm:$0xff] %v940_v32  ;;  %v1470_v37 = vadd.f32 %v1469_v31, %v940_v32  ;;  %v1604_v38 = vmul.f32 %v940_v32, %v940_v32  ;;  %v1730_v39 = vadd.f32 %v1729_v26, %v1603_v24  ;;  %v2138_v41 = vpop.f32.mrb[38].mxu0  ;;  %1407 = vst [vmem:[%s2462_s11 + $0x320] sm:$0xff] %v2654_v21  ;;  %v2659_v24 = vpop.f32.mrb[38].mxu1 }
 0x14c   : > { %1346 = vst [vmem:[%s2462_s11 + $0x138] sm:$0xff] %v2138_v41  ;;  %v943_v46 = vpop.f32.mrb[39].mxu0  ;;  %v1607_v62 = vmul.f32 %v2138_v41, %v2138_v41  ;;  %1410 = vst [vmem:[%s2462_s11 + $0x338] sm:$0xff] %v2659_v24  ;;  %v2664_v32 = vpop.f32.mrb[39].mxu1 }
 0x14d   : > { %v1731_v52 = vadd.f32 %v1730_v39, %v1604_v38  ;;  %1344 = vst [vmem:[%s2462_s11 + $0x128] sm:$0xff] %v943_v46  ;;  %v1471_v55 = vadd.f32 %v1470_v37, %v943_v46  ;;  %v1605_v56 = vmul.f32 %v943_v46, %v943_v46  ;;  %1408 = vst [vmem:[%s2462_s11 + $0x328] sm:$0xff] %v2664_v32 }
 0x14f   : > { %v1472_v60 = vadd.f32 %v2137_v29, %v1471_v55  ;;  %v1732_v61 = vadd.f32 %v1731_v52, %v1605_v56 }
 0x151   : > { %v1733_v1 = vadd.f32 %v1732_v61, %v1606_v59  ;;  %v2141_v2 = vpop.f32.mrb[40].mxu0  ;;  %v1473_v3 = vadd.f32 %v2138_v41, %v1472_v60  ;;  %v2669_v59 = vpop.f32.mrb[40].mxu1 }
 0x152   : > { %1349 = vst [vmem:[%s2462_s11 + $0x150] sm:$0xff] %v2141_v2  ;;  %v956_v7 = vpop.f32.mrb[41].mxu0  ;;  %v1610_v37 = vmul.f32 %v2141_v2, %v2141_v2  ;;  %1413 = vst [vmem:[%s2462_s11 + $0x350] sm:$0xff] %v2669_v59 }
 0x153   : > { %1347 = vst [vmem:[%s2462_s11 + $0x140] sm:$0xff] %v956_v7  ;;  %v1474_v13 = vadd.f32 %v1473_v3, %v956_v7  ;;  %v1608_v15 = vmul.f32 %v956_v7, %v956_v7  ;;  %v1734_v16 = vadd.f32 %v1733_v1, %v1607_v62  ;;  %v2142_v20 = vpop.f32.mrb[42].mxu0 }
 0x154   : > { %1350 = vst [vmem:[%s2462_s11 + $0x158] sm:$0xff] %v2142_v20  ;;  %v959_v22 = vpop.f32.mrb[43].mxu0  ;;  %v1611_v41 = vmul.f32 %v2142_v20, %v2142_v20 }
 0x155   : > { %v1735_v26 = vadd.f32 %v1734_v16, %v1608_v15  ;;  %1348 = vst [vmem:[%s2462_s11 + $0x148] sm:$0xff] %v959_v22  ;;  %v1475_v29 = vadd.f32 %v1474_v13, %v959_v22  ;;  %v1609_v31 = vmul.f32 %v959_v22, %v959_v22 }
 0x157   : > { %v1476_v38 = vadd.f32 %v2141_v2, %v1475_v29  ;;  %v1736_v39 = vadd.f32 %v1735_v26, %v1609_v31  ;;  %v2674_v2 = vpop.f32.mrb[41].mxu1 }
 0x158   : > { %1411 = vst [vmem:[%s2462_s11 + $0x340] sm:$0xff] %v2674_v2  ;;  %v2679_v7 = vpop.f32.mrb[42].mxu1 }
 0x159   : > { %v1737_v46 = vadd.f32 %v1736_v39, %v1610_v37  ;;  %v2145_v52 = vpop.f32.mrb[44].mxu0  ;;  %v1477_v55 = vadd.f32 %v2142_v20, %v1476_v38  ;;  %1414 = vst [vmem:[%s2462_s11 + $0x358] sm:$0xff] %v2679_v7  ;;  %v2684_v20 = vpop.f32.mrb[43].mxu1 }
 0x15a   : > { %1353 = vst [vmem:[%s2462_s11 + $0x170] sm:$0xff] %v2145_v52  ;;  %v972_v56 = vpop.f32.mrb[45].mxu0  ;;  %1412 = vst [vmem:[%s2462_s11 + $0x348] sm:$0xff] %v2684_v20  ;;  %v1614_v22 = vmul.f32 %v2145_v52, %v2145_v52 }
 0x15b   : > { %1351 = vst [vmem:[%s2462_s11 + $0x160] sm:$0xff] %v972_v56  ;;  %v1478_v60 = vadd.f32 %v1477_v55, %v972_v56  ;;  %v1612_v61 = vmul.f32 %v972_v56, %v972_v56  ;;  %v1738_v62 = vadd.f32 %v1737_v46, %v1611_v41  ;;  %v2146_v1 = vpop.f32.mrb[46].mxu0  ;;  %v2689_v46 = vpop.f32.mrb[44].mxu1 }
 0x15c   : > { %1354 = vst [vmem:[%s2462_s11 + $0x178] sm:$0xff] %v2146_v1  ;;  %v975_v3 = vpop.f32.mrb[47].mxu0  ;;  %v1615_v31 = vmul.f32 %v2146_v1, %v2146_v1  ;;  %3014 = vst [vmem:[#allocation2_spill] sm:$0xff] %v2689_v46 }
 0x15d   : > { %v1739_v13 = vadd.f32 %v1738_v62, %v1612_v61  ;;  %1352 = vst [vmem:[%s2462_s11 + $0x168] sm:$0xff] %v975_v3  ;;  %v1479_v15 = vadd.f32 %v1478_v60, %v975_v3  ;;  %v1613_v16 = vmul.f32 %v975_v3, %v975_v3  ;;  %1417 = vst [vmem:[%s2462_s11 + $0x370] sm:$0xff] %v2689_v46 }
 0x15f   : > { %v1480_v26 = vadd.f32 %v2145_v52, %v1479_v15  ;;  %v1740_v29 = vadd.f32 %v1739_v13, %v1613_v16  ;;  %v2694_v52 = vpop.f32.mrb[45].mxu1 }
 0x160   : > { %1415 = vst [vmem:[%s2462_s11 + $0x360] sm:$0xff] %v2694_v52 }
 0x161   : > { %v1741_v37 = vadd.f32 %v1740_v29, %v1614_v22  ;;  %v2149_v38 = vpop.f32.mrb[48].mxu0  ;;  %v1481_v39 = vadd.f32 %v2146_v1, %v1480_v26  ;;  %v2699_v1 = vpop.f32.mrb[46].mxu1 }
 0x162   : > { %1357 = vst [vmem:[%s2462_s11 + $0x190] sm:$0xff] %v2149_v38  ;;  %v988_v41 = vpop.f32.mrb[49].mxu0  ;;  %3015 = vst [vmem:[#allocation3_spill] sm:$0xff] %v2699_v1  ;;  %v2704_v16 = vpop.f32.mrb[47].mxu1  ;;  %v1618_v22 = vmul.f32 %v2149_v38, %v2149_v38 }
 0x163   : > { %1355 = vst [vmem:[%s2462_s11 + $0x180] sm:$0xff] %v988_v41  ;;  %v1482_v55 = vadd.f32 %v1481_v39, %v988_v41  ;;  %v1616_v56 = vmul.f32 %v988_v41, %v988_v41  ;;  %v1742_v60 = vadd.f32 %v1741_v37, %v1615_v31  ;;  %v2150_v61 = vpop.f32.mrb[50].mxu0  ;;  %1418 = vst [vmem:[%s2462_s11 + $0x378] sm:$0xff] %v2699_v1 }
 0x164   : > { %1358 = vst [vmem:[%s2462_s11 + $0x198] sm:$0xff] %v2150_v61  ;;  %v991_v62 = vpop.f32.mrb[51].mxu0  ;;  %1416 = vst [vmem:[%s2462_s11 + $0x368] sm:$0xff] %v2704_v16  ;;  %v1619_v31 = vmul.f32 %v2150_v61, %v2150_v61 }
 0x165   : > { %v1743_v3 = vadd.f32 %v1742_v60, %v1616_v56  ;;  %1356 = vst [vmem:[%s2462_s11 + $0x188] sm:$0xff] %v991_v62  ;;  %v1483_v13 = vadd.f32 %v1482_v55, %v991_v62  ;;  %v1617_v15 = vmul.f32 %v991_v62, %v991_v62  ;;  %v2709_v56 = vpop.f32.mrb[48].mxu1 }
 0x166   : > { %3016 = vst [vmem:[#allocation4_spill] sm:$0xff] %v2709_v56  ;;  %1421 = vst [vmem:[%s2462_s11 + $0x390] sm:$0xff] %v2709_v56 }
 0x167   : > { %v1484_v26 = vadd.f32 %v2149_v38, %v1483_v13  ;;  %v1744_v29 = vadd.f32 %v1743_v3, %v1617_v15  ;;  %v2714_v38 = vpop.f32.mrb[49].mxu1 }
 0x168   : > { %3017 = vst [vmem:[#allocation5_spill] sm:$0xff] %v2714_v38  ;;  %1419 = vst [vmem:[%s2462_s11 + $0x380] sm:$0xff] %v2714_v38 }
 0x169   : > { %v1745_v37 = vadd.f32 %v1744_v29, %v1618_v22  ;;  %v2153_v39 = vpop.f32.mrb[52].mxu0  ;;  %v1485_v41 = vadd.f32 %v2150_v61, %v1484_v26  ;;  %v2719_v61 = vpop.f32.mrb[50].mxu1 }
 0x16a   : > { %1361 = vst [vmem:[%s2462_s11 + $0x1b0] sm:$0xff] %v2153_v39  ;;  %v1004_v55 = vpop.f32.mrb[53].mxu0  ;;  %3018 = vst [vmem:[#allocation6_spill] sm:$0xff] %v2719_v61  ;;  %v2724_v26 = vpop.f32.mrb[51].mxu1  ;;  %v1622_v29 = vmul.f32 %v2153_v39, %v2153_v39 }
 0x16b   : > { %1359 = vst [vmem:[%s2462_s11 + $0x1a0] sm:$0xff] %v1004_v55  ;;  %v1486_v60 = vadd.f32 %v1485_v41, %v1004_v55  ;;  %v1620_v62 = vmul.f32 %v1004_v55, %v1004_v55  ;;  %v1746_v1 = vadd.f32 %v1745_v37, %v1619_v31  ;;  %v2154_v46 = vpop.f32.mrb[54].mxu0  ;;  %1422 = vst [vmem:[%s2462_s11 + $0x398] sm:$0xff] %v2719_v61 }
 0x16c   : > { %1362 = vst [vmem:[%s2462_s11 + $0x1b8] sm:$0xff] %v2154_v46  ;;  %v1007_v3 = vpop.f32.mrb[55].mxu0  ;;  %3019 = vst [vmem:[#allocation7_spill] sm:$0xff] %v2724_v26  ;;  %v1623_v41 = vmul.f32 %v2154_v46, %v2154_v46 }
 0x16d   : > { %v1747_v13 = vadd.f32 %v1746_v1, %v1620_v62  ;;  %1360 = vst [vmem:[%s2462_s11 + $0x1a8] sm:$0xff] %v1007_v3  ;;  %v1487_v15 = vadd.f32 %v1486_v60, %v1007_v3  ;;  %v1621_v22 = vmul.f32 %v1007_v3, %v1007_v3  ;;  %1420 = vst [vmem:[%s2462_s11 + $0x388] sm:$0xff] %v2724_v26  ;;  %v2729_v62 = vpop.f32.mrb[52].mxu1 }
 0x16e   : > { %3020 = vst [vmem:[#allocation8_spill] sm:$0xff] %v2729_v62  ;;  %1425 = vst [vmem:[%s2462_s11 + $0x3b0] sm:$0xff] %v2729_v62 }
 0x16f   : > { %v1488_v31 = vadd.f32 %v2153_v39, %v1487_v15  ;;  %v1748_v37 = vadd.f32 %v1747_v13, %v1621_v22  ;;  %v2734_v39 = vpop.f32.mrb[53].mxu1 }
 0x170   : > { %3021 = vst [vmem:[#allocation9_spill] sm:$0xff] %v2734_v39  ;;  %1423 = vst [vmem:[%s2462_s11 + $0x3a0] sm:$0xff] %v2734_v39 }
 0x171   : > { %v1749_v55 = vadd.f32 %v1748_v37, %v1622_v29  ;;  %v2157_v56 = vpop.f32.mrb[56].mxu0  ;;  %v1489_v1 = vadd.f32 %v2154_v46, %v1488_v31  ;;  %v2739_v46 = vpop.f32.mrb[54].mxu1 }
 0x172   : > { %1365 = vst [vmem:[%s2462_s11 + $0x1d0] sm:$0xff] %v2157_v56  ;;  %v1020_v60 = vpop.f32.mrb[57].mxu0  ;;  %3022 = vst [vmem:[#allocation10_spill] sm:$0xff] %v2739_v46  ;;  %v2744_v31 = vpop.f32.mrb[55].mxu1  ;;  %v1626_v37 = vmul.f32 %v2157_v56, %v2157_v56 }
 0x173   : > { %1363 = vst [vmem:[%s2462_s11 + $0x1c0] sm:$0xff] %v1020_v60  ;;  %v1490_v3 = vadd.f32 %v1489_v1, %v1020_v60  ;;  %v1624_v61 = vmul.f32 %v1020_v60, %v1020_v60  ;;  %v1750_v26 = vadd.f32 %v1749_v55, %v1623_v41  ;;  %v2158_v38 = vpop.f32.mrb[58].mxu0  ;;  %1426 = vst [vmem:[%s2462_s11 + $0x3b8] sm:$0xff] %v2739_v46 }
 0x174   : > { %1366 = vst [vmem:[%s2462_s11 + $0x1d8] sm:$0xff] %v2158_v38  ;;  %v1023_v13 = vpop.f32.mrb[59].mxu0  ;;  %3023 = vst [vmem:[#allocation11_spill] sm:$0xff] %v2744_v31  ;;  %v1627_v1 = vmul.f32 %v2158_v38, %v2158_v38 }
 0x175   : > { %v1751_v15 = vadd.f32 %v1750_v26, %v1624_v61  ;;  %1364 = vst [vmem:[%s2462_s11 + $0x1c8] sm:$0xff] %v1023_v13  ;;  %v1491_v22 = vadd.f32 %v1490_v3, %v1023_v13  ;;  %v1625_v29 = vmul.f32 %v1023_v13, %v1023_v13  ;;  %1424 = vst [vmem:[%s2462_s11 + $0x3a8] sm:$0xff] %v2744_v31  ;;  %v2749_v3 = vpop.f32.mrb[56].mxu1 }
 0x176   : > { %3024 = vst [vmem:[#allocation12_spill] sm:$0xff] %v2749_v3  ;;  %1429 = vst [vmem:[%s2462_s11 + $0x3d0] sm:$0xff] %v2749_v3 }
 0x177   : > { %v1492_v41 = vadd.f32 %v2157_v56, %v1491_v22  ;;  %v1752_v55 = vadd.f32 %v1751_v15, %v1625_v29  ;;  %v2754_v56 = vpop.f32.mrb[57].mxu1 }
 0x178   : > { %1427 = vst [vmem:[%s2462_s11 + $0x3c0] sm:$0xff] %v2754_v56 }
 0x179   : > { %v1753_v60 = vadd.f32 %v1752_v55, %v1626_v37  ;;  %v2161_v62 = vpop.f32.mrb[60].mxu0  ;;  %v1493_v61 = vadd.f32 %v2158_v38, %v1492_v41  ;;  %v2759_v38 = vpop.f32.mrb[58].mxu1 }
 0x17a   : > { %1369 = vst [vmem:[%s2462_s11 + $0x1f0] sm:$0xff] %v2161_v62  ;;  %v1036_v26 = vpop.f32.mrb[61].mxu0  ;;  %3025 = vst [vmem:[#allocation13_spill] sm:$0xff] %v2759_v38  ;;  %v2764_v41 = vpop.f32.mrb[59].mxu1  ;;  %v1630_v55 = vmul.f32 %v2161_v62, %v2161_v62 }
 0x17b   : > { %1367 = vst [vmem:[%s2462_s11 + $0x1e0] sm:$0xff] %v1036_v26  ;;  %v1494_v13 = vadd.f32 %v1493_v61, %v1036_v26  ;;  %v1628_v46 = vmul.f32 %v1036_v26, %v1036_v26  ;;  %v1754_v31 = vadd.f32 %v1753_v60, %v1627_v1  ;;  %v2162_v39 = vpop.f32.mrb[62].mxu0  ;;  %1430 = vst [vmem:[%s2462_s11 + $0x3d8] sm:$0xff] %v2759_v38 }
 0x17c   : > { %1370 = vst [vmem:[%s2462_s11 + $0x1f8] sm:$0xff] %v2162_v39  ;;  %v1039_v15 = vpop.f32.mrb[63].mxu0  ;;  %1428 = vst [vmem:[%s2462_s11 + $0x3c8] sm:$0xff] %v2764_v41  ;;  %v1631_v61 = vmul.f32 %v2162_v39, %v2162_v39 }
 0x17d   : > { %v1755_v22 = vadd.f32 %v1754_v31, %v1628_v46  ;;  %1368 = vst [vmem:[%s2462_s11 + $0x1e8] sm:$0xff] %v1039_v15  ;;  %v1495_v29 = vadd.f32 %v1494_v13, %v1039_v15  ;;  %v1629_v37 = vmul.f32 %v1039_v15, %v1039_v15  ;;  %v1632_v46 = vmul.f32 %v2474_v28, %v2474_v28  ;;  %v2770_v31 = vpop.f32.mrb[60].mxu1 }
 0x17e   : > { %1433 = vst [vmem:[%s2462_s11 + $0x3f0] sm:$0xff] %v2770_v31  ;;  %v2775_v38 = vpop.f32.mrb[61].mxu1 }
 0x17f   : > { %v1496_v1 = vadd.f32 %v2161_v62, %v1495_v29  ;;  %v1756_v60 = vadd.f32 %v1755_v22, %v1629_v37  ;;  %1431 = vst [vmem:[%s2462_s11 + $0x3e0] sm:$0xff] %v2775_v38  ;;  %v2779_v62 = vpop.f32.mrb[62].mxu1  ;;  %v1633_v29 = vmul.f32 %v2484_v34, %v2484_v34 }
 0x180   : > { %3026 = vst [vmem:[#allocation14_spill] sm:$0xff] %v2779_v62  ;;  %1434 = vst [vmem:[%s2462_s11 + $0x3f8] sm:$0xff] %v2779_v62  ;;  %v2786_v37 = vpop.f32.mrb[63].mxu1  ;;  %v1637_v62 = vmul.f32 %v2504_v54, %v2504_v54 }
 0x181   : > { %v1497_v26 = vadd.f32 %v2162_v39, %v1496_v1  ;;  %v1757_v3 = vadd.f32 %v1756_v60, %v1630_v55  ;;  %1432 = vst [vmem:[%s2462_s11 + $0x3e8] sm:$0xff] %v2786_v37  ;;  %v1635_v1 = vmul.f32 %v2479_v30, %v2479_v30 }
 0x183   : > { %v1758_v13 = vadd.f32 %v1757_v3, %v1631_v61  ;;  %v1498_v15 = vadd.f32 %v1497_v26, %v2474_v28  ;;  %v1634_v28 = vmul.f32 %v2469_v23, %v2469_v23 }
 0x185   : > { %v1759_v22 = vadd.f32 %v1758_v13, %v1632_v46  ;;  %v1499_v39 = vadd.f32 %v1498_v15, %v2484_v34  ;;  %v1636_v34 = vmul.f32 %v2494_v48, %v2494_v48 }
 0x187   : > { %v1500_v3 = vadd.f32 %v2469_v23, %v1499_v39  ;;  %v1760_v55 = vadd.f32 %v1759_v22, %v1633_v29  ;;  %v1638_v23 = vmul.f32 %v2489_v43, %v2489_v43 }
 0x189   : > { %v1761_v60 = vadd.f32 %v1760_v55, %v1634_v28  ;;  %v1501_v61 = vadd.f32 %v2479_v30, %v1500_v3  ;;  %v1639_v30 = vmul.f32 %v2499_v50, %v2499_v50 }
 0x18b   : > { %v1502_v26 = vadd.f32 %v1501_v61, %v2494_v48  ;;  %v1762_v46 = vadd.f32 %v1761_v60, %v1635_v1  ;;  %v1640_v48 = vmul.f32 %v2514_v4, %v2514_v4  ;;  %v1641_v60 = vmul.f32 %v2524_v10, %v2524_v10 }
 0x18d   : > { %v1763_v13 = vadd.f32 %v1762_v46, %v1636_v34  ;;  %v1503_v15 = vadd.f32 %v1502_v26, %v2504_v54 }
 0x18f   : > { %v1504_v22 = vadd.f32 %v2489_v43, %v1503_v15  ;;  %v1764_v39 = vadd.f32 %v1763_v13, %v1637_v62  ;;  %v1642_v43 = vmul.f32 %v2509_v63, %v2509_v63 }
 0x191   : > { %v1765_v29 = vadd.f32 %v1764_v39, %v1638_v23  ;;  %v1505_v28 = vadd.f32 %v2499_v50, %v1504_v22  ;;  %v1643_v50 = vmul.f32 %v2519_v6, %v2519_v6  ;;  %v1645_v23 = vmul.f32 %v2544_v33, %v2544_v33 }
 0x193   : > { %v1506_v3 = vadd.f32 %v1505_v28, %v2514_v4  ;;  %v1766_v55 = vadd.f32 %v1765_v29, %v1639_v30  ;;  %v1644_v4 = vmul.f32 %v2534_v25, %v2534_v25 }
 0x195   : > { %v1767_v1 = vadd.f32 %v1766_v55, %v1640_v48  ;;  %v1507_v54 = vadd.f32 %v1506_v3, %v2524_v10  ;;  %v1649_v55 = vmul.f32 %v2564_v58, %v2564_v58 }
 0x197   : > { %v1508_v62 = vadd.f32 %v2509_v63, %v1507_v54  ;;  %v1768_v61 = vadd.f32 %v1767_v1, %v1641_v60  ;;  %v1646_v63 = vmul.f32 %v2529_v19, %v2529_v19 }
 0x199   : > { %v1769_v34 = vadd.f32 %v1768_v61, %v1642_v43  ;;  %v1509_v26 = vadd.f32 %v2519_v6, %v1508_v62  ;;  %v1647_v6 = vmul.f32 %v2539_v27, %v2539_v27 }
 0x19b   : > { %v1510_v46 = vadd.f32 %v1509_v26, %v2534_v25  ;;  %v1770_v13 = vadd.f32 %v1769_v34, %v1643_v50  ;;  %v1648_v25 = vmul.f32 %v2554_v51, %v2554_v51  ;;  %v1653_v34 = vmul.f32 %v2584_v18, %v2584_v18 }
 0x19d   : > { %v1771_v15 = vadd.f32 %v1770_v13, %v1644_v4  ;;  %v1511_v10 = vadd.f32 %v1510_v46, %v2544_v33 }
 0x19f   : > { %v1512_v22 = vadd.f32 %v2529_v19, %v1511_v10  ;;  %v1772_v39 = vadd.f32 %v1771_v15, %v1645_v23  ;;  %v1650_v19 = vmul.f32 %v2549_v44, %v2549_v44 }
 0x1a1   : > { %v1773_v30 = vadd.f32 %v1772_v39, %v1646_v63  ;;  %v1513_v29 = vadd.f32 %v2539_v27, %v1512_v22  ;;  %v1651_v27 = vmul.f32 %v2559_v53, %v2559_v53  ;;  %v1657_v63 = vmul.f32 %v2604_v49, %v2604_v49 }
 0x1a3   : > { %v1514_v28 = vadd.f32 %v1513_v29, %v2554_v51  ;;  %v1774_v48 = vadd.f32 %v1773_v30, %v1647_v6  ;;  %v1652_v51 = vmul.f32 %v2574_v12, %v2574_v12 }
 0x1a5   : > { %v1775_v3 = vadd.f32 %v1774_v48, %v1648_v25  ;;  %v1515_v33 = vadd.f32 %v1514_v28, %v2564_v58  ;;  %v1661_v48 = vmul.f32 %v2624_v17, %v2624_v17 }
 0x1a7   : > { %v1516_v1 = vadd.f32 %v2549_v44, %v1515_v33  ;;  %v1776_v54 = vadd.f32 %v1775_v3, %v1649_v55  ;;  %v1654_v44 = vmul.f32 %v2569_v5, %v2569_v5 }
 0x1a9   : > { %v1777_v60 = vadd.f32 %v1776_v54, %v1650_v19  ;;  %v1517_v43 = vadd.f32 %v2559_v53, %v1516_v1  ;;  %v1655_v53 = vmul.f32 %v2579_v14, %v2579_v14 }
 0x1ab   : > { %v1518_v62 = vadd.f32 %v1517_v43, %v2574_v12  ;;  %v1778_v61 = vadd.f32 %v1777_v60, %v1651_v27  ;;  %v1656_v12 = vmul.f32 %v2594_v40, %v2594_v40  ;;  %v1665_v60 = vmul.f32 %v2644_v57, %v2644_v57 }
 0x1ad   : > { %v1779_v50 = vadd.f32 %v1778_v61, %v1652_v51  ;;  %v1519_v58 = vadd.f32 %v1518_v62, %v2584_v18 }
 0x1af   : > { %v1520_v26 = vadd.f32 %v2569_v5, %v1519_v58  ;;  %v1780_v4 = vadd.f32 %v1779_v50, %v1653_v34  ;;  %v1658_v5 = vmul.f32 %v2589_v35, %v2589_v35 }
 0x1b1   : > { %v1781_v46 = vadd.f32 %v1780_v4, %v1654_v44  ;;  %v1521_v13 = vadd.f32 %v2579_v14, %v1520_v26  ;;  %v1659_v14 = vmul.f32 %v2599_v42, %v2599_v42  ;;  %v1669_v44 = vmul.f32 %v2664_v32, %v2664_v32 }
 0x1b3   : > { %v1522_v15 = vadd.f32 %v1521_v13, %v2594_v40  ;;  %v1782_v10 = vadd.f32 %v1781_v46, %v1655_v53  ;;  %v1660_v40 = vmul.f32 %v2614_v8, %v2614_v8 }
 0x1b5   : > { %v1783_v23 = vadd.f32 %v1782_v10, %v1656_v12  ;;  %v1523_v18 = vadd.f32 %v1522_v15, %v2604_v49  ;;  %v1673_v10 = vmul.f32 %v2684_v20, %v2684_v20 }
 0x1b7   : > { %v1524_v22 = vadd.f32 %v2589_v35, %v1523_v18  ;;  %v1784_v39 = vadd.f32 %v1783_v23, %v1657_v63  ;;  %v1662_v35 = vmul.f32 %v2609_v0, %v2609_v0 }
 0x1b9   : > { %v1785_v6 = vadd.f32 %v1784_v39, %v1658_v5  ;;  %v1525_v30 = vadd.f32 %v2599_v42, %v1524_v22  ;;  %v1663_v42 = vmul.f32 %v2619_v11, %v2619_v11 }
 0x1bb   : > { %v1526_v29 = vadd.f32 %v1525_v30, %v2614_v8  ;;  %v1786_v25 = vadd.f32 %v1785_v6, %v1659_v14  ;;  %v1664_v8 = vmul.f32 %v2634_v45, %v2634_v45  ;;  %v1677_v6 = vmul.f32 %v2704_v16, %v2704_v16 }
 0x1bd   : > { %v1787_v28 = vadd.f32 %v1786_v25, %v1660_v40  ;;  %v1527_v49 = vadd.f32 %v1526_v29, %v2624_v17  ;;  %v3028_v25 = vld [vmem:[#allocation3_spill] sm:$0xff] }
 0x1bf   : > { %v1528_v3 = vadd.f32 %v2609_v0, %v1527_v49  ;;  %v1788_v33 = vadd.f32 %v1787_v28, %v1661_v48  ;;  %v1666_v0 = vmul.f32 %v2629_v36, %v2629_v36 }
 0x1c1   : > { %v1789_v55 = vadd.f32 %v1788_v33, %v1662_v35  ;;  %v1529_v19 = vadd.f32 %v2619_v11, %v1528_v3  ;;  %v1667_v11 = vmul.f32 %v2639_v47, %v2639_v47 }
 0x1c3   : > { %v1530_v1 = vadd.f32 %v1529_v19, %v2634_v45  ;;  %v1790_v54 = vadd.f32 %v1789_v55, %v1663_v42  ;;  %v1668_v45 = vmul.f32 %v2654_v21, %v2654_v21  ;;  %v3031_v19 = vld [vmem:[#allocation4_spill] sm:$0xff] }
 0x1c5   : > { %v1791_v27 = vadd.f32 %v1790_v54, %v1664_v8  ;;  %v1531_v17 = vadd.f32 %v1530_v1, %v2644_v57  ;;  %v1682_v8 = vmul.f32 %v3031_v19, %v3031_v19 }
 0x1c7   : > { %v1532_v43 = vadd.f32 %v2629_v36, %v1531_v17  ;;  %v1792_v51 = vadd.f32 %v1791_v27, %v1665_v60  ;;  %v1670_v36 = vmul.f32 %v2649_v9, %v2649_v9  ;;  %v3032_v27 = vld [vmem:[#allocation6_spill] sm:$0xff] }
 0x1c8   : > { %v1683_v17 = vmul.f32 %v3032_v27, %v3032_v27 }
 0x1c9   : > { %v1793_v62 = vadd.f32 %v1792_v51, %v1666_v0  ;;  %v1533_v61 = vadd.f32 %v2639_v47, %v1532_v43  ;;  %v1671_v47 = vmul.f32 %v2659_v24, %v2659_v24  ;;  %v3033_v43 = vld [vmem:[#allocation9_spill] sm:$0xff] }
 0x1ca   : > { %v1684_v51 = vmul.f32 %v3033_v43, %v3033_v43 }
 0x1cb   : > { %v1534_v50 = vadd.f32 %v1533_v61, %v2654_v21  ;;  %v1794_v58 = vadd.f32 %v1793_v62, %v1667_v11  ;;  %v1672_v21 = vmul.f32 %v2674_v2, %v2674_v2 }
 0x1cd   : > { %v1795_v34 = vadd.f32 %v1794_v58, %v1668_v45  ;;  %v1535_v57 = vadd.f32 %v1534_v50, %v2664_v32  ;;  %v3034_v45 = vld [vmem:[#allocation11_spill] sm:$0xff] }
 0x1ce   : > { %v1685_v58 = vmul.f32 %v3034_v45, %v3034_v45 }
 0x1cf   : > { %v1536_v26 = vadd.f32 %v2649_v9, %v1535_v57  ;;  %v1796_v4 = vadd.f32 %v1795_v34, %v1669_v44  ;;  %v1674_v9 = vmul.f32 %v2669_v59, %v2669_v59  ;;  %v3035_v34 = vld [vmem:[#allocation8_spill] sm:$0xff] }
 0x1d0   : > { %v1686_v57 = vmul.f32 %v3035_v34, %v3035_v34 }
 0x1d1   : > { %v1797_v53 = vadd.f32 %v1796_v4, %v1670_v36  ;;  %v1537_v46 = vadd.f32 %v2659_v24, %v1536_v26  ;;  %v1675_v24 = vmul.f32 %v2679_v7, %v2679_v7  ;;  %v3036_v26 = vld [vmem:[#allocation10_spill] sm:$0xff] }
 0x1d2   : > { %v1687_v4 = vmul.f32 %v3036_v26, %v3036_v26 }
 0x1d3   : > { %v1538_v13 = vadd.f32 %v1537_v46, %v2674_v2  ;;  %v1798_v12 = vadd.f32 %v1797_v53, %v1671_v47  ;;  %v1676_v2 = vmul.f32 %v2694_v52, %v2694_v52  ;;  %v1688_v46 = vmul.f32 %v2754_v56, %v2754_v56 }
 0x1d5   : > { %v1799_v15 = vadd.f32 %v1798_v12, %v1672_v21  ;;  %v1539_v32 = vadd.f32 %v1538_v13, %v2684_v20 }
 0x1d7   : > { %v1540_v23 = vadd.f32 %v2669_v59, %v1539_v32  ;;  %v1800_v18 = vadd.f32 %v1799_v15, %v1673_v10  ;;  %v3027_v59 = vld [vmem:[#allocation2_spill] sm:$0xff]  ;;  %v1689_v32 = vmul.f32 %v2764_v41, %v2764_v41  ;;  %v3037_v10 = vld [vmem:[#allocation12_spill] sm:$0xff] }
 0x1d8   : > { %v1678_v30 = vmul.f32 %v3027_v59, %v3027_v59 }
 0x1d9   : > { %v1801_v63 = vadd.f32 %v1800_v18, %v1674_v9  ;;  %v1541_v5 = vadd.f32 %v2679_v7, %v1540_v23  ;;  %v1679_v7 = vmul.f32 %v3028_v25, %v3028_v25  ;;  %v1690_v9 = vmul.f32 %v3037_v10, %v3037_v10 }
 0x1db   : > { %v1542_v22 = vadd.f32 %v1541_v5, %v2694_v52  ;;  %v1802_v39 = vadd.f32 %v1801_v63, %v1675_v24  ;;  %v3029_v52 = vld [vmem:[#allocation5_spill] sm:$0xff] }
 0x1dc   : > { %v1680_v48 = vmul.f32 %v3029_v52, %v3029_v52  ;;  %v3038_v24 = vld [vmem:[#allocation13_spill] sm:$0xff] }
 0x1dd   : > { %v1803_v14 = vadd.f32 %v1802_v39, %v1676_v2  ;;  %v1543_v20 = vadd.f32 %v1542_v22, %v2704_v16  ;;  %v3030_v16 = vld [vmem:[#allocation7_spill] sm:$0xff]  ;;  %v1691_v63 = vmul.f32 %v3038_v24, %v3038_v24  ;;  %v1692_v2 = vmul.f32 %v2775_v38, %v2775_v38 }
 0x1de   : > { %v1681_v55 = vmul.f32 %v3030_v16, %v3030_v16 }
 0x1df   : > { %v1544_v40 = vadd.f32 %v3027_v59, %v1543_v20  ;;  %v1804_v29 = vadd.f32 %v1803_v14, %v1677_v6  ;;  %v1693_v20 = vmul.f32 %v2786_v37, %v2786_v37  ;;  %v1694_v6 = vmul.f32 %v2770_v31, %v2770_v31 }
 0x1e1   : > { %v1805_v28 = vadd.f32 %v1804_v29, %v1678_v30  ;;  %v1545_v49 = vadd.f32 %v3028_v25, %v1544_v40  ;;  %v3039_v40 = vld [vmem:[#allocation14_spill] sm:$0xff] }
 0x1e2   : > { %v1695_v29 = vmul.f32 %v3039_v40, %v3039_v40 }
 0x1e3   : > { %v1546_v35 = vadd.f32 %v1545_v49, %v3029_v52  ;;  %v1806_v3 = vadd.f32 %v1805_v28, %v1679_v7 }
 0x1e5   : > { %v1807_v33 = vadd.f32 %v1806_v3, %v1680_v48  ;;  %v1547_v42 = vadd.f32 %v1546_v35, %v3030_v16  ;;  %v1829_v48 = vlaneseq }
 0x1e7   : > { %v1548_v1 = vadd.f32 %v3031_v19, %v1547_v42  ;;  %v1808_v54 = vadd.f32 %v1807_v33, %v1681_v55  ;;  %v1830_v16 = vshrl.u32 %v1829_v48, 7 }
 0x1e9   : > { %v1809_v60 = vadd.f32 %v1808_v54, %v1682_v8  ;;  %v1549_v0 = vadd.f32 %v3032_v27, %v1548_v1  ;;  %vm1832_vm0 = vcmp.eq.s32.totalorder %v1830_v16, 1  ;;  %vm1831_vm1 = vcmp.eq.s32.totalorder %v1830_v16, 0 }
 0x1eb   : > { %v1550_v11 = vadd.f32 %v1549_v0, %v3033_v43  ;;  %v1810_v62 = vadd.f32 %v1809_v60, %v1683_v17 }
 0x1ed   : > { %v1811_v61 = vadd.f32 %v1810_v62, %v1684_v51  ;;  %v1551_v50 = vadd.f32 %v1550_v11, %v3034_v45 }
 0x1ef   : > { %v1552_v44 = vadd.f32 %v3035_v34, %v1551_v50  ;;  %v1812_v36 = vadd.f32 %v1811_v61, %v1685_v58 }
 0x1f1   : > { %v1813_v47 = vadd.f32 %v1812_v36, %v1686_v57  ;;  %v1553_v53 = vadd.f32 %v3036_v26, %v1552_v44 }
 0x1f3   : > { %v1554_v21 = vadd.f32 %v1553_v53, %v2754_v56  ;;  %v1814_v13 = vadd.f32 %v1813_v47, %v1687_v4 }
 0x1f5   : > { %v1815_v12 = vadd.f32 %v1814_v13, %v1688_v46  ;;  %v1555_v15 = vadd.f32 %v1554_v21, %v2764_v41 }
 0x1f7   : > { %v1556_v23 = vadd.f32 %v3037_v10, %v1555_v15  ;;  %v1816_v18 = vadd.f32 %v1815_v12, %v1689_v32 }
 0x1f9   : > { %v1817_v5 = vadd.f32 %v1816_v18, %v1690_v9  ;;  %v1557_v56 = vadd.f32 %v3038_v24, %v1556_v23 }
 0x1fb   : > { %v1558_v22 = vadd.f32 %v1557_v56, %v2775_v38  ;;  %v1818_v39 = vadd.f32 %v1817_v5, %v1691_v63 }
 0x1fd   : > { %v1819_v41 = vadd.f32 %v1818_v39, %v1692_v2  ;;  %v1559_v14 = vadd.f32 %v1558_v22, %v2786_v37 }
 0x1ff   : > { %v1560_v59 = vadd.f32 %v2770_v31, %v1559_v14  ;;  %v1820_v30 = vadd.f32 %v1819_v41, %v1693_v20 }
 0x201   : > { %v1561_v25 = vadd.f32 %v3039_v40, %v1560_v59  ;;  %v1821_v38 = vadd.f32 %v1820_v30, %v1694_v6 }
 0x203   : > { %v1562_v7 = vrot.slane %v1561_v25, 4  ;;  %v1822_v28 = vadd.f32 %v1821_v38, %v1695_v29 }
 0x205   : > { %v1563_v49 = vadd.f32 %v1562_v7, %v1561_v25  ;;  %v1823_v52 = vrot.slane %v1822_v28, 4 }
 0x207   : > { %v1564_v35 = vrot.slane %v1563_v49, 2  ;;  %v1824_v37 = vadd.f32 %v1823_v52, %v1822_v28 }
 0x209   : > { %v1565_v3 = vadd.f32 %v1564_v35, %v1563_v49  ;;  %v1825_v33 = vrot.slane %v1824_v37, 2 }
 0x20b   : > { %v1826_v31 = vadd.f32 %v1825_v33, %v1824_v37  ;;  %v1566_v42 = vrot.slane %v1565_v3, 1 }
 0x20d   : > { %v1827_v55 = vrot.slane %v1826_v31, 1  ;;  %v1567_v8 = vadd.f32 %v1566_v42, %v1565_v3 }
 0x20f   : > { %v1828_v19 = vadd.f32 %v1827_v55, %v1826_v31 }
 0x211   : > { %v1835_v1 = vsel %vm1832_vm0, %v1828_v19, 0.0 }
 0x212   : > { %v1838_v54 = vsel %vm1831_vm1, %v1567_v8, %v1835_v1 }
 0x213   : > { %1839 = vst [vmem:[%s184_s17] sm:$0xff] %v1838_v54 }
 0x214 PF: > { %s14_s12 = sadd.s32 1, %s2329_s12  }
 0x215   : > { %p11_p5 = scmp.ge.s32.totalorder %s14_s12, 6  }
 0x217   :  { %13 = sbr.rel (!%p11_p5) target bundleno = 1 (0x1), region = 70 }

// kernel: conv3d_forward.3
= control target key start
LH: loop header
LB: loop body
LE: loop exit
PB: predicated region body
PF: predicated region fallthrough
CT: control target
= control target key end

     0   :  { %s1259_s15 = smov 0   ;;  %s1950_s0 = inlined_call_operand.vmem [shape: f32[4096,128], index: 0, kind: input, shape index: {}]   ;;  %s1951_s1 = inlined_call_operand.vmem [shape: f32[1,128], index: 1, kind: input, shape index: {}]   ;;  %s1952_s2 = inlined_call_operand.vmem [shape: f32[1,128], index: 2, kind: input, shape index: {}]   ;;  %s1953_s3 = inlined_call_operand.vmem [shape: f32[4096,128], index: 3, kind: input, shape index: {}]   ;;  %s1954_s4 = inlined_call_operand.vmem [shape: f32[4096,128], index: 4, kind: output, shape index: {}]  }
   0x1 LB: > { %s1201_s16 = sadd.s32 4294967295, %s1232_s15   ;;  %p1205_p0 = scmp.ge.s32.totalorder %s1232_s15, 1  ;;  %s1232_s15 = sphi %s1259_s15, %s14_s15  }
   0x2   : > { %p174_p1 = scmp.lt.s32.totalorder %s1232_s15, 5 }
   0x4   : > { %p175_p2 = pnand %p1205_p0, %p174_p1 }
   0x5   : > { %s1206_s17 = sshll.u32 (!%p175_p2), %s1201_s16, 7  ;;  %v1272_v0 = vld [vmem:[%s1951_s1] ss:$0 sm:$0xff] (!%p175_p2) }
   0x6   : > { %178 = sbr.rel (%p175_p2) target bundleno = 151 (0x97), region = 36  ;;  %p206_p3 = scmp.lt.s32.totalorder (!%p175_p2), %s1206_s17, 511  ;;  %v1290_v2 = vld [vmem:[%s1952_s2] ss:$0 sm:$0xff] (!%p175_p2) }
   0xd   : > { %s1956_s17 = smov (!%p206_p3, %s1206_s17), 511 }
   0xe   : > { %s1267_s18 = sshll.u32 %s1956_s17, 3 }
   0xf   : > { %s1278_s23 = scalar_lea.vmem %s1950_s0, %s1267_s18  ;;  %s1284_s26 = scalar_lea.vmem %s1953_s3, %s1267_s18 }
  0x10   : > { %v223_v1 = vld [vmem:[%s1278_s23] sm:$0xff]  ;;  %v224_v3 = vld [vmem:[%s1278_s23 + $0x8] sm:$0xff]  ;;  %v225_v7 = vld [vmem:[%s1278_s23 + $0x10] sm:$0xff]  ;;  %s1320_s5 = scalar_lea.vmem %s1954_s4, %s1267_s18 }
  0x11   : > { %v358_v4 = vmul.f32 %v1272_v0, %v223_v1  ;;  %v621_v5 = vld [vmem:[%s1284_s26] sm:$0xff]  ;;  %v359_v6 = vmul.f32 %v1272_v0, %v224_v3  ;;  %v622_v8 = vld [vmem:[%s1284_s26 + $0x8] sm:$0xff]  ;;  %v360_v9 = vmul.f32 %v1272_v0, %v225_v7  ;;  %v226_v10 = vld [vmem:[%s1278_s23 + $0x18] sm:$0xff] }
  0x12   : > { %v227_v11 = vld [vmem:[%s1278_s23 + $0x20] sm:$0xff]  ;;  %v623_v14 = vld [vmem:[%s1284_s26 + $0x10] sm:$0xff]  ;;  %v361_v15 = vmul.f32 %v1272_v0, %v226_v10  ;;  %v624_v16 = vld [vmem:[%s1284_s26 + $0x18] sm:$0xff] }
  0x13   : > { %v493_v12 = vadd.f32 %v1290_v2, %v358_v4  ;;  %v494_v13 = vadd.f32 %v1290_v2, %v359_v6  ;;  %v362_v17 = vmul.f32 %v1272_v0, %v227_v11  ;;  %v228_v18 = vld [vmem:[%s1278_s23 + $0x28] sm:$0xff]  ;;  %v495_v19 = vadd.f32 %v1290_v2, %v360_v9  ;;  %v625_v20 = vld [vmem:[%s1284_s26 + $0x20] sm:$0xff]  ;;  %v229_v22 = vld [vmem:[%s1278_s23 + $0x30] sm:$0xff] }
  0x14   : > { %v363_v21 = vmul.f32 %v1272_v0, %v228_v18  ;;  %v230_v23 = vld [vmem:[%s1278_s23 + $0x38] sm:$0xff]  ;;  %v496_v26 = vadd.f32 %v1290_v2, %v361_v15  ;;  %v626_v28 = vld [vmem:[%s1284_s26 + $0x28] sm:$0xff]  ;;  %v364_v31 = vmul.f32 %v1272_v0, %v229_v22  ;;  %v231_v33 = vld [vmem:[%s1278_s23 + $0x40] sm:$0xff] }
  0x15   : > { %v749_v24 = vadd.f32 %v621_v5, %v493_v12  ;;  %v750_v25 = vadd.f32 %v622_v8, %v494_v13  ;;  %v497_v27 = vadd.f32 %v1290_v2, %v362_v17  ;;  %v751_v29 = vadd.f32 %v623_v14, %v495_v19  ;;  %v232_v34 = vld [vmem:[%s1278_s23 + $0x48] sm:$0xff]  ;;  %v627_v39 = vld [vmem:[%s1284_s26 + $0x30] sm:$0xff]  ;;  %v628_v40 = vld [vmem:[%s1284_s26 + $0x38] sm:$0xff] }
  0x16   : > { %v498_v30 = vadd.f32 %v1290_v2, %v363_v21  ;;  %v365_v32 = vmul.f32 %v1272_v0, %v230_v23  ;;  %v752_v37 = vadd.f32 %v624_v16, %v496_v26  ;;  %v233_v41 = vld [vmem:[%s1278_s23 + $0x50] sm:$0xff]  ;;  %v499_v44 = vadd.f32 %v1290_v2, %v364_v31  ;;  %v234_v46 = vld [vmem:[%s1278_s23 + $0x58] sm:$0xff]  ;;  %v235_v47 = vld [vmem:[%s1278_s23 + $0x60] sm:$0xff] }
  0x17   : > { %v877_v35 = vmax.f32 %v749_v24, 0.0  ;;  %v878_v36 = vmax.f32 %v750_v25, 0.0  ;;  %v753_v38 = vadd.f32 %v625_v20, %v497_v27  ;;  %v879_v42 = vmax.f32 %v751_v29, 0.0  ;;  %v236_v52 = vld [vmem:[%s1278_s23 + $0x68] sm:$0xff]  ;;  %v629_v56 = vld [vmem:[%s1284_s26 + $0x40] sm:$0xff]  ;;  %v631_v61 = vld [vmem:[%s1284_s26 + $0x50] sm:$0xff] }
  0x18   : > { %v754_v43 = vadd.f32 %v626_v28, %v498_v30  ;;  %v500_v45 = vadd.f32 %v1290_v2, %v365_v32  ;;  %v880_v48 = vmax.f32 %v752_v37, 0.0  ;;  %v366_v50 = vmul.f32 %v1272_v0, %v231_v33  ;;  %v630_v57 = vld [vmem:[%s1284_s26 + $0x48] sm:$0xff]  ;;  %v237_v1 = vld [vmem:[%s1278_s23 + $0x70] sm:$0xff]  ;;  %v238_v3 = vld [vmem:[%s1278_s23 + $0x78] sm:$0xff] }
  0x19   : > { %1005 = vst [vmem:[%s1320_s5] sm:$0xff] %v877_v35  ;;  %1006 = vst [vmem:[%s1320_s5 + $0x8] sm:$0xff] %v878_v36  ;;  %v881_v49 = vmax.f32 %v753_v38, 0.0  ;;  %v367_v51 = vmul.f32 %v1272_v0, %v232_v34  ;;  %v755_v54 = vadd.f32 %v627_v39, %v499_v44  ;;  %v368_v58 = vmul.f32 %v1272_v0, %v233_v41  ;;  %v632_v7 = vld [vmem:[%s1284_s26 + $0x58] sm:$0xff]  ;;  %v633_v8 = vld [vmem:[%s1284_s26 + $0x60] sm:$0xff] }
  0x1a   : > { %1007 = vst [vmem:[%s1320_s5 + $0x10] sm:$0xff] %v879_v42  ;;  %v882_v53 = vmax.f32 %v754_v43, 0.0  ;;  %v756_v55 = vadd.f32 %v628_v40, %v500_v45  ;;  %1008 = vst [vmem:[%s1320_s5 + $0x18] sm:$0xff] %v880_v48  ;;  %v501_v59 = vadd.f32 %v1290_v2, %v366_v50  ;;  %v369_v62 = vmul.f32 %v1272_v0, %v234_v46  ;;  %v634_v14 = vld [vmem:[%s1284_s26 + $0x68] sm:$0xff]  ;;  %v239_v19 = vld [vmem:[%s1278_s23 + $0x80] sm:$0xff] }
  0x1b   : > { %1009 = vst [vmem:[%s1320_s5 + $0x20] sm:$0xff] %v881_v49  ;;  %v502_v60 = vadd.f32 %v1290_v2, %v367_v51  ;;  %v370_v63 = vmul.f32 %v1272_v0, %v235_v47  ;;  %v883_v4 = vmax.f32 %v755_v54, 0.0  ;;  %v503_v6 = vadd.f32 %v1290_v2, %v368_v58  ;;  %v240_v20 = vld [vmem:[%s1278_s23 + $0x88] sm:$0xff]  ;;  %v635_v25 = vld [vmem:[%s1284_s26 + $0x70] sm:$0xff]  ;;  %v636_v26 = vld [vmem:[%s1284_s26 + $0x78] sm:$0xff] }
  0x1c   : > { %1010 = vst [vmem:[%s1320_s5 + $0x28] sm:$0xff] %v882_v53  ;;  %v884_v5 = vmax.f32 %v756_v55, 0.0  ;;  %v371_v9 = vmul.f32 %v1272_v0, %v236_v52  ;;  %v757_v10 = vadd.f32 %v629_v56, %v501_v59  ;;  %v504_v12 = vadd.f32 %v1290_v2, %v369_v62  ;;  %v241_v27 = vld [vmem:[%s1278_s23 + $0x90] sm:$0xff]  ;;  %v242_v32 = vld [vmem:[%s1278_s23 + $0x98] sm:$0xff]  ;;  %v243_v33 = vld [vmem:[%s1278_s23 + $0xa0] sm:$0xff] }
  0x1d   : > { %v758_v11 = vadd.f32 %v630_v57, %v502_v60  ;;  %v505_v13 = vadd.f32 %v1290_v2, %v370_v63  ;;  %1011 = vst [vmem:[%s1320_s5 + $0x30] sm:$0xff] %v883_v4  ;;  %v759_v15 = vadd.f32 %v631_v61, %v503_v6  ;;  %v372_v17 = vmul.f32 %v1272_v0, %v237_v1  ;;  %v244_v38 = vld [vmem:[%s1278_s23 + $0xa8] sm:$0xff]  ;;  %v637_v42 = vld [vmem:[%s1284_s26 + $0x80] sm:$0xff]  ;;  %v639_v47 = vld [vmem:[%s1284_s26 + $0x90] sm:$0xff] }
  0x1e   : > { %1012 = vst [vmem:[%s1320_s5 + $0x38] sm:$0xff] %v884_v5  ;;  %v506_v16 = vadd.f32 %v1290_v2, %v371_v9  ;;  %v373_v18 = vmul.f32 %v1272_v0, %v238_v3  ;;  %v885_v21 = vmax.f32 %v757_v10, 0.0  ;;  %v760_v23 = vadd.f32 %v632_v7, %v504_v12  ;;  %v638_v43 = vld [vmem:[%s1284_s26 + $0x88] sm:$0xff]  ;;  %v245_v50 = vld [vmem:[%s1278_s23 + $0xb0] sm:$0xff]  ;;  %v246_v51 = vld [vmem:[%s1278_s23 + $0xb8] sm:$0xff] }
  0x1f   : > { %v886_v22 = vmax.f32 %v758_v11, 0.0  ;;  %v761_v24 = vadd.f32 %v633_v8, %v505_v13  ;;  %v887_v28 = vmax.f32 %v759_v15, 0.0  ;;  %v507_v30 = vadd.f32 %v1290_v2, %v372_v17  ;;  %v640_v55 = vld [vmem:[%s1284_s26 + $0x98] sm:$0xff]  ;;  %v641_v56 = vld [vmem:[%s1284_s26 + $0xa0] sm:$0xff]  ;;  %v642_v62 = vld [vmem:[%s1284_s26 + $0xa8] sm:$0xff] }
  0x20   : > { %v762_v29 = vadd.f32 %v634_v14, %v506_v16  ;;  %v508_v31 = vadd.f32 %v1290_v2, %v373_v18  ;;  %1013 = vst [vmem:[%s1320_s5 + $0x40] sm:$0xff] %v885_v21  ;;  %v888_v34 = vmax.f32 %v760_v23, 0.0  ;;  %v374_v36 = vmul.f32 %v1272_v0, %v239_v19  ;;  %v247_v5 = vld [vmem:[%s1278_s23 + $0xc0] sm:$0xff]  ;;  %v248_v6 = vld [vmem:[%s1278_s23 + $0xc8] sm:$0xff]  ;;  %v643_v11 = vld [vmem:[%s1284_s26 + $0xb0] sm:$0xff] }
  0x21   : > { %1014 = vst [vmem:[%s1320_s5 + $0x48] sm:$0xff] %v886_v22  ;;  %v889_v35 = vmax.f32 %v761_v24, 0.0  ;;  %v375_v37 = vmul.f32 %v1272_v0, %v240_v20  ;;  %1015 = vst [vmem:[%s1320_s5 + $0x50] sm:$0xff] %v887_v28  ;;  %v763_v40 = vadd.f32 %v635_v25, %v507_v30  ;;  %v376_v44 = vmul.f32 %v1272_v0, %v241_v27  ;;  %v644_v12 = vld [vmem:[%s1284_s26 + $0xb8] sm:$0xff]  ;;  %v249_v13 = vld [vmem:[%s1278_s23 + $0xd0] sm:$0xff] }
  0x22   : > { %v890_v39 = vmax.f32 %v762_v29, 0.0  ;;  %v764_v41 = vadd.f32 %v636_v26, %v508_v31  ;;  %1016 = vst [vmem:[%s1320_s5 + $0x58] sm:$0xff] %v888_v34  ;;  %v509_v45 = vadd.f32 %v1290_v2, %v374_v36  ;;  %v377_v48 = vmul.f32 %v1272_v0, %v242_v32  ;;  %v250_v18 = vld [vmem:[%s1278_s23 + $0xd8] sm:$0xff]  ;;  %v251_v19 = vld [vmem:[%s1278_s23 + $0xe0] sm:$0xff]  ;;  %v252_v24 = vld [vmem:[%s1278_s23 + $0xe8] sm:$0xff] }
  0x23   : > { %1017 = vst [vmem:[%s1320_s5 + $0x60] sm:$0xff] %v889_v35  ;;  %v510_v46 = vadd.f32 %v1290_v2, %v375_v37  ;;  %v378_v49 = vmul.f32 %v1272_v0, %v243_v33  ;;  %v891_v52 = vmax.f32 %v763_v40, 0.0  ;;  %v511_v54 = vadd.f32 %v1290_v2, %v376_v44  ;;  %v645_v28 = vld [vmem:[%s1284_s26 + $0xc0] sm:$0xff]  ;;  %v646_v29 = vld [vmem:[%s1284_s26 + $0xc8] sm:$0xff]  ;;  %v647_v33 = vld [vmem:[%s1284_s26 + $0xd0] sm:$0xff] }
  0x24   : > { %1018 = vst [vmem:[%s1320_s5 + $0x68] sm:$0xff] %v890_v39  ;;  %v892_v53 = vmax.f32 %v764_v41, 0.0  ;;  %v379_v57 = vmul.f32 %v1272_v0, %v244_v38  ;;  %v765_v58 = vadd.f32 %v637_v42, %v509_v45  ;;  %v512_v60 = vadd.f32 %v1290_v2, %v377_v48  ;;  %v253_v36 = vld [vmem:[%s1278_s23 + $0xf0] sm:$0xff]  ;;  %v254_v37 = vld [vmem:[%s1278_s23 + $0xf8] sm:$0xff]  ;;  %v649_v42 = vld [vmem:[%s1284_s26 + $0xe0] sm:$0xff] }
  0x25   : > { %v766_v59 = vadd.f32 %v638_v43, %v510_v46  ;;  %v513_v61 = vadd.f32 %v1290_v2, %v378_v49  ;;  %1019 = vst [vmem:[%s1320_s5 + $0x70] sm:$0xff] %v891_v52  ;;  %v767_v63 = vadd.f32 %v639_v47, %v511_v54  ;;  %v380_v3 = vmul.f32 %v1272_v0, %v245_v50  ;;  %v648_v41 = vld [vmem:[%s1284_s26 + $0xd8] sm:$0xff]  ;;  %v650_v48 = vld [vmem:[%s1284_s26 + $0xe8] sm:$0xff] }
  0x26   : > { %1020 = vst [vmem:[%s1320_s5 + $0x78] sm:$0xff] %v892_v53  ;;  %v514_v1 = vadd.f32 %v1290_v2, %v379_v57  ;;  %v381_v4 = vmul.f32 %v1272_v0, %v246_v51  ;;  %v893_v7 = vmax.f32 %v765_v58, 0.0  ;;  %v768_v9 = vadd.f32 %v640_v55, %v512_v60  ;;  %v255_v53 = vld [vmem:[%s1278_s23 + $0x100] sm:$0xff]  ;;  %v256_v54 = vld [vmem:[%s1278_s23 + $0x108] sm:$0xff]  ;;  %v652_v60 = vld [vmem:[%s1284_s26 + $0xf8] sm:$0xff] }
  0x27   : > { %v894_v8 = vmax.f32 %v766_v59, 0.0  ;;  %v769_v10 = vadd.f32 %v641_v56, %v513_v61  ;;  %v895_v14 = vmax.f32 %v767_v63, 0.0  ;;  %v515_v16 = vadd.f32 %v1290_v2, %v380_v3  ;;  %v651_v59 = vld [vmem:[%s1284_s26 + $0xf0] sm:$0xff] }
  0x28   : > { %v770_v15 = vadd.f32 %v642_v62, %v514_v1  ;;  %v516_v17 = vadd.f32 %v1290_v2, %v381_v4  ;;  %1021 = vst [vmem:[%s1320_s5 + $0x80] sm:$0xff] %v893_v7  ;;  %v896_v20 = vmax.f32 %v768_v9, 0.0  ;;  %v382_v22 = vmul.f32 %v1272_v0, %v247_v5  ;;  %v257_v61 = vld [vmem:[%s1278_s23 + $0x110] sm:$0xff]  ;;  %v258_v4 = vld [vmem:[%s1278_s23 + $0x118] sm:$0xff]  ;;  %v259_v5 = vld [vmem:[%s1278_s23 + $0x120] sm:$0xff] }
  0x29   : > { %1022 = vst [vmem:[%s1320_s5 + $0x88] sm:$0xff] %v894_v8  ;;  %v897_v21 = vmax.f32 %v769_v10, 0.0  ;;  %v383_v23 = vmul.f32 %v1272_v0, %v248_v6  ;;  %1023 = vst [vmem:[%s1320_s5 + $0x90] sm:$0xff] %v895_v14  ;;  %v771_v26 = vadd.f32 %v643_v11, %v515_v16  ;;  %v384_v30 = vmul.f32 %v1272_v0, %v249_v13  ;;  %v260_v10 = vld [vmem:[%s1278_s23 + $0x128] sm:$0xff]  ;;  %v653_v14 = vld [vmem:[%s1284_s26 + $0x100] sm:$0xff] }
  0x2a   : > { %v898_v25 = vmax.f32 %v770_v15, 0.0  ;;  %v772_v27 = vadd.f32 %v644_v12, %v516_v17  ;;  %1024 = vst [vmem:[%s1320_s5 + $0x98] sm:$0xff] %v896_v20  ;;  %v517_v31 = vadd.f32 %v1290_v2, %v382_v22  ;;  %v385_v34 = vmul.f32 %v1272_v0, %v250_v18  ;;  %v654_v15 = vld [vmem:[%s1284_s26 + $0x108] sm:$0xff]  ;;  %v261_v22 = vld [vmem:[%s1278_s23 + $0x130] sm:$0xff] }
  0x2b   : > { %1025 = vst [vmem:[%s1320_s5 + $0xa0] sm:$0xff] %v897_v21  ;;  %v518_v32 = vadd.f32 %v1290_v2, %v383_v23  ;;  %v386_v35 = vmul.f32 %v1272_v0, %v251_v19  ;;  %v899_v38 = vmax.f32 %v771_v26, 0.0  ;;  %v519_v40 = vadd.f32 %v1290_v2, %v384_v30  ;;  %v655_v19 = vld [vmem:[%s1284_s26 + $0x110] sm:$0xff]  ;;  %v262_v23 = vld [vmem:[%s1278_s23 + $0x138] sm:$0xff] }
  0x2c   : > { %1026 = vst [vmem:[%s1320_s5 + $0xa8] sm:$0xff] %v898_v25  ;;  %v900_v39 = vmax.f32 %v772_v27, 0.0  ;;  %v387_v43 = vmul.f32 %v1272_v0, %v252_v24  ;;  %v773_v44 = vadd.f32 %v645_v28, %v517_v31  ;;  %v520_v46 = vadd.f32 %v1290_v2, %v385_v34  ;;  %v656_v27 = vld [vmem:[%s1284_s26 + $0x118] sm:$0xff]  ;;  %v657_v28 = vld [vmem:[%s1284_s26 + $0x120] sm:$0xff]  ;;  %v658_v34 = vld [vmem:[%s1284_s26 + $0x128] sm:$0xff] }
  0x2d   : > { %v774_v45 = vadd.f32 %v646_v29, %v518_v32  ;;  %v521_v47 = vadd.f32 %v1290_v2, %v386_v35  ;;  %1027 = vst [vmem:[%s1320_s5 + $0xb0] sm:$0xff] %v899_v38  ;;  %v775_v49 = vadd.f32 %v647_v33, %v519_v40  ;;  %v388_v51 = vmul.f32 %v1272_v0, %v253_v36  ;;  %v264_v40 = vld [vmem:[%s1278_s23 + $0x148] sm:$0xff] }
  0x2e   : > { %1028 = vst [vmem:[%s1320_s5 + $0xb8] sm:$0xff] %v900_v39  ;;  %v522_v50 = vadd.f32 %v1290_v2, %v387_v43  ;;  %v389_v52 = vmul.f32 %v1272_v0, %v254_v37  ;;  %v901_v55 = vmax.f32 %v773_v44, 0.0  ;;  %v776_v57 = vadd.f32 %v648_v41, %v520_v46  ;;  %v263_v39 = vld [vmem:[%s1278_s23 + $0x140] sm:$0xff]  ;;  %v660_v46 = vld [vmem:[%s1284_s26 + $0x138] sm:$0xff] }
  0x2f   : > { %v902_v56 = vmax.f32 %v774_v45, 0.0  ;;  %v777_v58 = vadd.f32 %v649_v42, %v521_v47  ;;  %v903_v62 = vmax.f32 %v775_v49, 0.0  ;;  %v523_v1 = vadd.f32 %v1290_v2, %v388_v51  ;;  %v659_v45 = vld [vmem:[%s1284_s26 + $0x130] sm:$0xff] }
  0x30   : > { %v778_v63 = vadd.f32 %v650_v48, %v522_v50  ;;  %v524_v3 = vadd.f32 %v1290_v2, %v389_v52  ;;  %1029 = vst [vmem:[%s1320_s5 + $0xc0] sm:$0xff] %v901_v55  ;;  %v904_v6 = vmax.f32 %v776_v57, 0.0  ;;  %v390_v8 = vmul.f32 %v1272_v0, %v255_v53  ;;  %v265_v47 = vld [vmem:[%s1278_s23 + $0x150] sm:$0xff]  ;;  %v266_v52 = vld [vmem:[%s1278_s23 + $0x158] sm:$0xff]  ;;  %v267_v53 = vld [vmem:[%s1278_s23 + $0x160] sm:$0xff] }
  0x31   : > { %1030 = vst [vmem:[%s1320_s5 + $0xc8] sm:$0xff] %v902_v56  ;;  %v905_v7 = vmax.f32 %v777_v58, 0.0  ;;  %v391_v9 = vmul.f32 %v1272_v0, %v256_v54  ;;  %1031 = vst [vmem:[%s1320_s5 + $0xd0] sm:$0xff] %v903_v62  ;;  %v779_v12 = vadd.f32 %v651_v59, %v523_v1  ;;  %v392_v16 = vmul.f32 %v1272_v0, %v257_v61  ;;  %v268_v58 = vld [vmem:[%s1278_s23 + $0x168] sm:$0xff]  ;;  %v661_v62 = vld [vmem:[%s1284_s26 + $0x140] sm:$0xff] }
  0x32   : > { %v906_v11 = vmax.f32 %v778_v63, 0.0  ;;  %v780_v13 = vadd.f32 %v652_v60, %v524_v3  ;;  %1032 = vst [vmem:[%s1320_s5 + $0xd8] sm:$0xff] %v904_v6  ;;  %v525_v17 = vadd.f32 %v1290_v2, %v390_v8  ;;  %v393_v20 = vmul.f32 %v1272_v0, %v258_v4  ;;  %v662_v63 = vld [vmem:[%s1284_s26 + $0x148] sm:$0xff]  ;;  %v269_v8 = vld [vmem:[%s1278_s23 + $0x170] sm:$0xff] }
  0x33   : > { %1033 = vst [vmem:[%s1320_s5 + $0xe0] sm:$0xff] %v905_v7  ;;  %v526_v18 = vadd.f32 %v1290_v2, %v391_v9  ;;  %v394_v21 = vmul.f32 %v1272_v0, %v259_v5  ;;  %v907_v24 = vmax.f32 %v779_v12, 0.0  ;;  %v527_v26 = vadd.f32 %v1290_v2, %v392_v16  ;;  %v663_v5 = vld [vmem:[%s1284_s26 + $0x150] sm:$0xff]  ;;  %v270_v9 = vld [vmem:[%s1278_s23 + $0x178] sm:$0xff] }
  0x34   : > { %1034 = vst [vmem:[%s1320_s5 + $0xe8] sm:$0xff] %v906_v11  ;;  %v908_v25 = vmax.f32 %v780_v13, 0.0  ;;  %v395_v29 = vmul.f32 %v1272_v0, %v260_v10  ;;  %v781_v30 = vadd.f32 %v653_v14, %v525_v17  ;;  %v528_v32 = vadd.f32 %v1290_v2, %v393_v20  ;;  %v664_v13 = vld [vmem:[%s1284_s26 + $0x158] sm:$0xff]  ;;  %v665_v14 = vld [vmem:[%s1284_s26 + $0x160] sm:$0xff]  ;;  %v666_v20 = vld [vmem:[%s1284_s26 + $0x168] sm:$0xff] }
  0x35   : > { %v782_v31 = vadd.f32 %v654_v15, %v526_v18  ;;  %v529_v33 = vadd.f32 %v1290_v2, %v394_v21  ;;  %1035 = vst [vmem:[%s1320_s5 + $0xf0] sm:$0xff] %v907_v24  ;;  %v783_v35 = vadd.f32 %v655_v19, %v527_v26  ;;  %v396_v37 = vmul.f32 %v1272_v0, %v261_v22  ;;  %v272_v26 = vld [vmem:[%s1278_s23 + $0x188] sm:$0xff] }
  0x36   : > { %1036 = vst [vmem:[%s1320_s5 + $0xf8] sm:$0xff] %v908_v25  ;;  %v530_v36 = vadd.f32 %v1290_v2, %v395_v29  ;;  %v397_v38 = vmul.f32 %v1272_v0, %v262_v23  ;;  %v909_v41 = vmax.f32 %v781_v30, 0.0  ;;  %v784_v43 = vadd.f32 %v656_v27, %v528_v32  ;;  %v271_v25 = vld [vmem:[%s1278_s23 + $0x180] sm:$0xff]  ;;  %v668_v32 = vld [vmem:[%s1284_s26 + $0x178] sm:$0xff] }
  0x37   : > { %v910_v42 = vmax.f32 %v782_v31, 0.0  ;;  %v785_v44 = vadd.f32 %v657_v28, %v529_v33  ;;  %v911_v48 = vmax.f32 %v783_v35, 0.0  ;;  %v531_v50 = vadd.f32 %v1290_v2, %v396_v37  ;;  %v667_v31 = vld [vmem:[%s1284_s26 + $0x170] sm:$0xff] }
  0x38   : > { %v786_v49 = vadd.f32 %v658_v34, %v530_v36  ;;  %v532_v51 = vadd.f32 %v1290_v2, %v397_v38  ;;  %1037 = vst [vmem:[%s1320_s5 + $0x100] sm:$0xff] %v909_v41  ;;  %v912_v54 = vmax.f32 %v784_v43, 0.0  ;;  %v398_v56 = vmul.f32 %v1272_v0, %v263_v39  ;;  %v273_v33 = vld [vmem:[%s1278_s23 + $0x190] sm:$0xff]  ;;  %v274_v38 = vld [vmem:[%s1278_s23 + $0x198] sm:$0xff]  ;;  %v275_v39 = vld [vmem:[%s1278_s23 + $0x1a0] sm:$0xff] }
  0x39   : > { %1038 = vst [vmem:[%s1320_s5 + $0x108] sm:$0xff] %v910_v42  ;;  %v913_v55 = vmax.f32 %v785_v44, 0.0  ;;  %v399_v57 = vmul.f32 %v1272_v0, %v264_v40  ;;  %1039 = vst [vmem:[%s1320_s5 + $0x110] sm:$0xff] %v911_v48  ;;  %v787_v60 = vadd.f32 %v659_v45, %v531_v50  ;;  %v400_v1 = vmul.f32 %v1272_v0, %v265_v47  ;;  %v276_v44 = vld [vmem:[%s1278_s23 + $0x1a8] sm:$0xff]  ;;  %v669_v48 = vld [vmem:[%s1284_s26 + $0x180] sm:$0xff] }
  0x3a   : > { %v914_v59 = vmax.f32 %v786_v49, 0.0  ;;  %v788_v61 = vadd.f32 %v660_v46, %v532_v51  ;;  %1040 = vst [vmem:[%s1320_s5 + $0x118] sm:$0xff] %v912_v54  ;;  %v533_v3 = vadd.f32 %v1290_v2, %v398_v56  ;;  %v401_v6 = vmul.f32 %v1272_v0, %v266_v52  ;;  %v670_v49 = vld [vmem:[%s1284_s26 + $0x188] sm:$0xff]  ;;  %v277_v56 = vld [vmem:[%s1278_s23 + $0x1b0] sm:$0xff] }
  0x3b   : > { %1041 = vst [vmem:[%s1320_s5 + $0x120] sm:$0xff] %v913_v55  ;;  %v534_v4 = vadd.f32 %v1290_v2, %v399_v57  ;;  %v402_v7 = vmul.f32 %v1272_v0, %v267_v53  ;;  %v915_v10 = vmax.f32 %v787_v60, 0.0  ;;  %v535_v12 = vadd.f32 %v1290_v2, %v400_v1  ;;  %v671_v53 = vld [vmem:[%s1284_s26 + $0x190] sm:$0xff]  ;;  %v278_v57 = vld [vmem:[%s1278_s23 + $0x1b8] sm:$0xff] }
  0x3c   : > { %1042 = vst [vmem:[%s1320_s5 + $0x128] sm:$0xff] %v914_v59  ;;  %v916_v11 = vmax.f32 %v788_v61, 0.0  ;;  %v403_v15 = vmul.f32 %v1272_v0, %v268_v58  ;;  %v789_v16 = vadd.f32 %v661_v62, %v533_v3  ;;  %v536_v18 = vadd.f32 %v1290_v2, %v401_v6  ;;  %v672_v61 = vld [vmem:[%s1284_s26 + $0x198] sm:$0xff]  ;;  %v673_v62 = vld [vmem:[%s1284_s26 + $0x1a0] sm:$0xff]  ;;  %v674_v6 = vld [vmem:[%s1284_s26 + $0x1a8] sm:$0xff] }
  0x3d   : > { %v790_v17 = vadd.f32 %v662_v63, %v534_v4  ;;  %v537_v19 = vadd.f32 %v1290_v2, %v402_v7  ;;  %1043 = vst [vmem:[%s1320_s5 + $0x130] sm:$0xff] %v915_v10  ;;  %v791_v21 = vadd.f32 %v663_v5, %v535_v12  ;;  %v404_v23 = vmul.f32 %v1272_v0, %v269_v8  ;;  %v280_v12 = vld [vmem:[%s1278_s23 + $0x1c8] sm:$0xff] }
  0x3e   : > { %1044 = vst [vmem:[%s1320_s5 + $0x138] sm:$0xff] %v916_v11  ;;  %v538_v22 = vadd.f32 %v1290_v2, %v403_v15  ;;  %v405_v24 = vmul.f32 %v1272_v0, %v270_v9  ;;  %v917_v27 = vmax.f32 %v789_v16, 0.0  ;;  %v792_v29 = vadd.f32 %v664_v13, %v536_v18  ;;  %v279_v11 = vld [vmem:[%s1278_s23 + $0x1c0] sm:$0xff]  ;;  %v676_v18 = vld [vmem:[%s1284_s26 + $0x1b8] sm:$0xff] }
  0x3f   : > { %v918_v28 = vmax.f32 %v790_v17, 0.0  ;;  %v793_v30 = vadd.f32 %v665_v14, %v537_v19  ;;  %v919_v34 = vmax.f32 %v791_v21, 0.0  ;;  %v539_v36 = vadd.f32 %v1290_v2, %v404_v23  ;;  %v675_v17 = vld [vmem:[%s1284_s26 + $0x1b0] sm:$0xff] }
  0x40   : > { %v794_v35 = vadd.f32 %v666_v20, %v538_v22  ;;  %v540_v37 = vadd.f32 %v1290_v2, %v405_v24  ;;  %1045 = vst [vmem:[%s1320_s5 + $0x140] sm:$0xff] %v917_v27  ;;  %v920_v40 = vmax.f32 %v792_v29, 0.0  ;;  %v406_v42 = vmul.f32 %v1272_v0, %v271_v25  ;;  %v281_v19 = vld [vmem:[%s1278_s23 + $0x1d0] sm:$0xff]  ;;  %v282_v24 = vld [vmem:[%s1278_s23 + $0x1d8] sm:$0xff]  ;;  %v283_v25 = vld [vmem:[%s1278_s23 + $0x1e0] sm:$0xff] }
  0x41   : > { %1046 = vst [vmem:[%s1320_s5 + $0x148] sm:$0xff] %v918_v28  ;;  %v921_v41 = vmax.f32 %v793_v30, 0.0  ;;  %v407_v43 = vmul.f32 %v1272_v0, %v272_v26  ;;  %1047 = vst [vmem:[%s1320_s5 + $0x150] sm:$0xff] %v919_v34  ;;  %v795_v46 = vadd.f32 %v667_v31, %v539_v36  ;;  %v408_v50 = vmul.f32 %v1272_v0, %v273_v33  ;;  %v284_v30 = vld [vmem:[%s1278_s23 + $0x1e8] sm:$0xff]  ;;  %v677_v34 = vld [vmem:[%s1284_s26 + $0x1c0] sm:$0xff] }
  0x42   : > { %v922_v45 = vmax.f32 %v794_v35, 0.0  ;;  %v796_v47 = vadd.f32 %v668_v32, %v540_v37  ;;  %1048 = vst [vmem:[%s1320_s5 + $0x158] sm:$0xff] %v920_v40  ;;  %v541_v51 = vadd.f32 %v1290_v2, %v406_v42  ;;  %v409_v54 = vmul.f32 %v1272_v0, %v274_v38  ;;  %v678_v35 = vld [vmem:[%s1284_s26 + $0x1c8] sm:$0xff]  ;;  %v285_v42 = vld [vmem:[%s1278_s23 + $0x1f0] sm:$0xff] }
  0x43   : > { %1049 = vst [vmem:[%s1320_s5 + $0x160] sm:$0xff] %v921_v41  ;;  %v542_v52 = vadd.f32 %v1290_v2, %v407_v43  ;;  %v410_v55 = vmul.f32 %v1272_v0, %v275_v39  ;;  %v923_v58 = vmax.f32 %v795_v46, 0.0  ;;  %v543_v60 = vadd.f32 %v1290_v2, %v408_v50  ;;  %v679_v39 = vld [vmem:[%s1284_s26 + $0x1d0] sm:$0xff]  ;;  %v286_v43 = vld [vmem:[%s1278_s23 + $0x1f8] sm:$0xff] }
  0x44   : > { %1050 = vst [vmem:[%s1320_s5 + $0x168] sm:$0xff] %v922_v45  ;;  %v924_v59 = vmax.f32 %v796_v47, 0.0  ;;  %v411_v63 = vmul.f32 %v1272_v0, %v276_v44  ;;  %v797_v1 = vadd.f32 %v669_v48, %v541_v51  ;;  %v544_v4 = vadd.f32 %v1290_v2, %v409_v54  ;;  %v680_v47 = vld [vmem:[%s1284_s26 + $0x1d8] sm:$0xff]  ;;  %v681_v48 = vld [vmem:[%s1284_s26 + $0x1e0] sm:$0xff]  ;;  %v682_v54 = vld [vmem:[%s1284_s26 + $0x1e8] sm:$0xff] }
  0x45   : > { %v798_v3 = vadd.f32 %v670_v49, %v542_v52  ;;  %v545_v5 = vadd.f32 %v1290_v2, %v410_v55  ;;  %1051 = vst [vmem:[%s1320_s5 + $0x170] sm:$0xff] %v923_v58  ;;  %v799_v7 = vadd.f32 %v671_v53, %v543_v60  ;;  %v412_v9 = vmul.f32 %v1272_v0, %v277_v56  ;;  %v288_v60 = vld [vmem:[%s1278_s23 + $0x208] sm:$0xff] }
  0x46   : > { %1052 = vst [vmem:[%s1320_s5 + $0x178] sm:$0xff] %v924_v59  ;;  %v546_v8 = vadd.f32 %v1290_v2, %v411_v63  ;;  %v413_v10 = vmul.f32 %v1272_v0, %v278_v57  ;;  %v925_v13 = vmax.f32 %v797_v1, 0.0  ;;  %v800_v15 = vadd.f32 %v672_v61, %v544_v4  ;;  %v287_v59 = vld [vmem:[%s1278_s23 + $0x200] sm:$0xff]  ;;  %v684_v4 = vld [vmem:[%s1284_s26 + $0x1f8] sm:$0xff] }
  0x47   : > { %v926_v14 = vmax.f32 %v798_v3, 0.0  ;;  %v801_v16 = vadd.f32 %v673_v62, %v545_v5  ;;  %v927_v20 = vmax.f32 %v799_v7, 0.0  ;;  %v547_v22 = vadd.f32 %v1290_v2, %v412_v9  ;;  %v683_v3 = vld [vmem:[%s1284_s26 + $0x1f0] sm:$0xff] }
  0x48   : > { %v802_v21 = vadd.f32 %v674_v6, %v546_v8  ;;  %v548_v23 = vadd.f32 %v1290_v2, %v413_v10  ;;  %1053 = vst [vmem:[%s1320_s5 + $0x180] sm:$0xff] %v925_v13  ;;  %v928_v26 = vmax.f32 %v800_v15, 0.0  ;;  %v414_v28 = vmul.f32 %v1272_v0, %v279_v11  ;;  %v289_v5 = vld [vmem:[%s1278_s23 + $0x210] sm:$0xff]  ;;  %v290_v10 = vld [vmem:[%s1278_s23 + $0x218] sm:$0xff]  ;;  %v291_v11 = vld [vmem:[%s1278_s23 + $0x220] sm:$0xff] }
  0x49   : > { %1054 = vst [vmem:[%s1320_s5 + $0x188] sm:$0xff] %v926_v14  ;;  %v929_v27 = vmax.f32 %v801_v16, 0.0  ;;  %v415_v29 = vmul.f32 %v1272_v0, %v280_v12  ;;  %1055 = vst [vmem:[%s1320_s5 + $0x190] sm:$0xff] %v927_v20  ;;  %v803_v32 = vadd.f32 %v675_v17, %v547_v22  ;;  %v416_v36 = vmul.f32 %v1272_v0, %v281_v19  ;;  %v292_v16 = vld [vmem:[%s1278_s23 + $0x228] sm:$0xff]  ;;  %v685_v20 = vld [vmem:[%s1284_s26 + $0x200] sm:$0xff] }
  0x4a   : > { %v930_v31 = vmax.f32 %v802_v21, 0.0  ;;  %v804_v33 = vadd.f32 %v676_v18, %v548_v23  ;;  %1056 = vst [vmem:[%s1320_s5 + $0x198] sm:$0xff] %v928_v26  ;;  %v549_v37 = vadd.f32 %v1290_v2, %v414_v28  ;;  %v417_v40 = vmul.f32 %v1272_v0, %v282_v24  ;;  %v686_v21 = vld [vmem:[%s1284_s26 + $0x208] sm:$0xff]  ;;  %v293_v28 = vld [vmem:[%s1278_s23 + $0x230] sm:$0xff] }
  0x4b   : > { %1057 = vst [vmem:[%s1320_s5 + $0x1a0] sm:$0xff] %v929_v27  ;;  %v550_v38 = vadd.f32 %v1290_v2, %v415_v29  ;;  %v418_v41 = vmul.f32 %v1272_v0, %v283_v25  ;;  %v931_v44 = vmax.f32 %v803_v32, 0.0  ;;  %v551_v46 = vadd.f32 %v1290_v2, %v416_v36  ;;  %v687_v25 = vld [vmem:[%s1284_s26 + $0x210] sm:$0xff]  ;;  %v294_v29 = vld [vmem:[%s1278_s23 + $0x238] sm:$0xff] }
  0x4c   : > { %1058 = vst [vmem:[%s1320_s5 + $0x1a8] sm:$0xff] %v930_v31  ;;  %v932_v45 = vmax.f32 %v804_v33, 0.0  ;;  %v419_v49 = vmul.f32 %v1272_v0, %v284_v30  ;;  %v805_v50 = vadd.f32 %v677_v34, %v549_v37  ;;  %v552_v52 = vadd.f32 %v1290_v2, %v417_v40  ;;  %v688_v33 = vld [vmem:[%s1284_s26 + $0x218] sm:$0xff]  ;;  %v689_v34 = vld [vmem:[%s1284_s26 + $0x220] sm:$0xff]  ;;  %v690_v40 = vld [vmem:[%s1284_s26 + $0x228] sm:$0xff] }
  0x4d   : > { %v806_v51 = vadd.f32 %v678_v35, %v550_v38  ;;  %v553_v53 = vadd.f32 %v1290_v2, %v418_v41  ;;  %1059 = vst [vmem:[%s1320_s5 + $0x1b0] sm:$0xff] %v931_v44  ;;  %v807_v55 = vadd.f32 %v679_v39, %v551_v46  ;;  %v420_v57 = vmul.f32 %v1272_v0, %v285_v42  ;;  %v296_v46 = vld [vmem:[%s1278_s23 + $0x248] sm:$0xff] }
  0x4e   : > { %1060 = vst [vmem:[%s1320_s5 + $0x1b8] sm:$0xff] %v932_v45  ;;  %v554_v56 = vadd.f32 %v1290_v2, %v419_v49  ;;  %v421_v58 = vmul.f32 %v1272_v0, %v286_v43  ;;  %v933_v61 = vmax.f32 %v805_v50, 0.0  ;;  %v808_v63 = vadd.f32 %v680_v47, %v552_v52  ;;  %v295_v45 = vld [vmem:[%s1278_s23 + $0x240] sm:$0xff]  ;;  %v692_v52 = vld [vmem:[%s1284_s26 + $0x238] sm:$0xff] }
  0x4f   : > { %v934_v62 = vmax.f32 %v806_v51, 0.0  ;;  %v809_v1 = vadd.f32 %v681_v48, %v553_v53  ;;  %v935_v6 = vmax.f32 %v807_v55, 0.0  ;;  %v555_v8 = vadd.f32 %v1290_v2, %v420_v57  ;;  %v691_v51 = vld [vmem:[%s1284_s26 + $0x230] sm:$0xff] }
  0x50   : > { %v810_v7 = vadd.f32 %v682_v54, %v554_v56  ;;  %v556_v9 = vadd.f32 %v1290_v2, %v421_v58  ;;  %1061 = vst [vmem:[%s1320_s5 + $0x1c0] sm:$0xff] %v933_v61  ;;  %v936_v12 = vmax.f32 %v808_v63, 0.0  ;;  %v422_v14 = vmul.f32 %v1272_v0, %v287_v59  ;;  %v297_v53 = vld [vmem:[%s1278_s23 + $0x250] sm:$0xff]  ;;  %v298_v58 = vld [vmem:[%s1278_s23 + $0x258] sm:$0xff]  ;;  %v299_v59 = vld [vmem:[%s1278_s23 + $0x260] sm:$0xff] }
  0x51   : > { %1062 = vst [vmem:[%s1320_s5 + $0x1c8] sm:$0xff] %v934_v62  ;;  %v937_v13 = vmax.f32 %v809_v1, 0.0  ;;  %v423_v15 = vmul.f32 %v1272_v0, %v288_v60  ;;  %1063 = vst [vmem:[%s1320_s5 + $0x1d0] sm:$0xff] %v935_v6  ;;  %v811_v18 = vadd.f32 %v683_v3, %v555_v8  ;;  %v424_v22 = vmul.f32 %v1272_v0, %v289_v5  ;;  %v300_v1 = vld [vmem:[%s1278_s23 + $0x268] sm:$0xff]  ;;  %v693_v6 = vld [vmem:[%s1284_s26 + $0x240] sm:$0xff] }
  0x52   : > { %v938_v17 = vmax.f32 %v810_v7, 0.0  ;;  %v812_v19 = vadd.f32 %v684_v4, %v556_v9  ;;  %1064 = vst [vmem:[%s1320_s5 + $0x1d8] sm:$0xff] %v936_v12  ;;  %v557_v23 = vadd.f32 %v1290_v2, %v422_v14  ;;  %v425_v26 = vmul.f32 %v1272_v0, %v290_v10  ;;  %v694_v7 = vld [vmem:[%s1284_s26 + $0x248] sm:$0xff]  ;;  %v1665_v8 = vld [vmem:[%s1951_s1] ss:$0 sm:$0xff]  ;;  %v695_v12 = vld [vmem:[%s1284_s26 + $0x250] sm:$0xff] }
  0x53   : > { %1065 = vst [vmem:[%s1320_s5 + $0x1e0] sm:$0xff] %v937_v13  ;;  %v558_v24 = vadd.f32 %v1290_v2, %v423_v15  ;;  %v426_v27 = vmul.f32 %v1272_v0, %v291_v11  ;;  %v939_v30 = vmax.f32 %v811_v18, 0.0  ;;  %v559_v32 = vadd.f32 %v1290_v2, %v424_v22  ;;  %v1674_v10 = vld [vmem:[%s1952_s2] ss:$0 sm:$0xff]  ;;  %v301_v15 = vld [vmem:[%s1278_s23 + $0x270] sm:$0xff] }
  0x54   : > { %1066 = vst [vmem:[%s1320_s5 + $0x1e8] sm:$0xff] %v938_v17  ;;  %v940_v31 = vmax.f32 %v812_v19, 0.0  ;;  %v427_v35 = vmul.f32 %v1272_v0, %v292_v16  ;;  %v813_v36 = vadd.f32 %v685_v20, %v557_v23  ;;  %v560_v38 = vadd.f32 %v1290_v2, %v425_v26  ;;  %v302_v16 = vld [vmem:[%s1278_s23 + $0x278] sm:$0xff]  ;;  %v697_v20 = vld [vmem:[%s1284_s26 + $0x260] sm:$0xff]  ;;  %v698_v26 = vld [vmem:[%s1284_s26 + $0x268] sm:$0xff] }
  0x55   : > { %v814_v37 = vadd.f32 %v686_v21, %v558_v24  ;;  %v561_v39 = vadd.f32 %v1290_v2, %v426_v27  ;;  %1067 = vst [vmem:[%s1320_s5 + $0x1f0] sm:$0xff] %v939_v30  ;;  %v815_v41 = vadd.f32 %v687_v25, %v559_v32  ;;  %v428_v43 = vmul.f32 %v1272_v0, %v293_v28  ;;  %v696_v19 = vld [vmem:[%s1284_s26 + $0x258] sm:$0xff]  ;;  %v304_v32 = vld [vmem:[%s1278_s23 + $0x288] sm:$0xff] }
  0x56   : > { %1068 = vst [vmem:[%s1320_s5 + $0x1f8] sm:$0xff] %v940_v31  ;;  %v562_v42 = vadd.f32 %v1290_v2, %v427_v35  ;;  %v429_v44 = vmul.f32 %v1272_v0, %v294_v29  ;;  %v941_v47 = vmax.f32 %v813_v36, 0.0  ;;  %v816_v49 = vadd.f32 %v688_v33, %v560_v38  ;;  %v303_v31 = vld [vmem:[%s1278_s23 + $0x280] sm:$0xff]  ;;  %v700_v38 = vld [vmem:[%s1284_s26 + $0x278] sm:$0xff] }
  0x57   : > { %v942_v48 = vmax.f32 %v814_v37, 0.0  ;;  %v817_v50 = vadd.f32 %v689_v34, %v561_v39  ;;  %v943_v54 = vmax.f32 %v815_v41, 0.0  ;;  %v563_v56 = vadd.f32 %v1290_v2, %v428_v43  ;;  %v699_v37 = vld [vmem:[%s1284_s26 + $0x270] sm:$0xff] }
  0x58   : > { %v818_v55 = vadd.f32 %v690_v40, %v562_v42  ;;  %v564_v57 = vadd.f32 %v1290_v2, %v429_v44  ;;  %1069 = vst [vmem:[%s1320_s5 + $0x200] sm:$0xff] %v941_v47  ;;  %v944_v60 = vmax.f32 %v816_v49, 0.0  ;;  %v430_v62 = vmul.f32 %v1272_v0, %v295_v45  ;;  %v305_v39 = vld [vmem:[%s1278_s23 + $0x290] sm:$0xff]  ;;  %v306_v44 = vld [vmem:[%s1278_s23 + $0x298] sm:$0xff]  ;;  %v307_v45 = vld [vmem:[%s1278_s23 + $0x2a0] sm:$0xff] }
  0x59   : > { %1070 = vst [vmem:[%s1320_s5 + $0x208] sm:$0xff] %v942_v48  ;;  %v945_v61 = vmax.f32 %v817_v50, 0.0  ;;  %v431_v63 = vmul.f32 %v1272_v0, %v296_v46  ;;  %1071 = vst [vmem:[%s1320_s5 + $0x210] sm:$0xff] %v943_v54  ;;  %v819_v4 = vadd.f32 %v691_v51, %v563_v56  ;;  %v432_v9 = vmul.f32 %v1665_v8, %v297_v53  ;;  %v308_v50 = vld [vmem:[%s1278_s23 + $0x2a8] sm:$0xff]  ;;  %v701_v54 = vld [vmem:[%s1284_s26 + $0x280] sm:$0xff] }
  0x5a   : > { %v946_v3 = vmax.f32 %v818_v55, 0.0  ;;  %v820_v5 = vadd.f32 %v692_v52, %v564_v57  ;;  %1072 = vst [vmem:[%s1320_s5 + $0x218] sm:$0xff] %v944_v60  ;;  %v565_v0 = vadd.f32 %v1290_v2, %v430_v62  ;;  %v433_v13 = vmul.f32 %v1665_v8, %v298_v58  ;;  %v702_v55 = vld [vmem:[%s1284_s26 + $0x288] sm:$0xff]  ;;  %v309_v62 = vld [vmem:[%s1278_s23 + $0x2b0] sm:$0xff] }
  0x5b   : > { %1073 = vst [vmem:[%s1320_s5 + $0x220] sm:$0xff] %v945_v61  ;;  %v566_v11 = vadd.f32 %v1674_v10, %v431_v63  ;;  %v434_v14 = vmul.f32 %v1665_v8, %v299_v59  ;;  %v947_v17 = vmax.f32 %v819_v4, 0.0  ;;  %v567_v18 = vadd.f32 %v1674_v10, %v432_v9  ;;  %v703_v59 = vld [vmem:[%s1284_s26 + $0x290] sm:$0xff]  ;;  %v310_v63 = vld [vmem:[%s1278_s23 + $0x2b8] sm:$0xff] }
  0x5c   : > { %1074 = vst [vmem:[%s1320_s5 + $0x228] sm:$0xff] %v946_v3  ;;  %v948_v2 = vmax.f32 %v820_v5, 0.0  ;;  %v435_v21 = vmul.f32 %v1665_v8, %v300_v1  ;;  %v821_v22 = vadd.f32 %v693_v6, %v565_v0  ;;  %v568_v24 = vadd.f32 %v1674_v10, %v433_v13  ;;  %v704_v5 = vld [vmem:[%s1284_s26 + $0x298] sm:$0xff]  ;;  %v705_v6 = vld [vmem:[%s1284_s26 + $0x2a0] sm:$0xff]  ;;  %v706_v13 = vld [vmem:[%s1284_s26 + $0x2a8] sm:$0xff] }
  0x5d   : > { %v822_v23 = vadd.f32 %v694_v7, %v566_v11  ;;  %v569_v25 = vadd.f32 %v1674_v10, %v434_v14  ;;  %1075 = vst [vmem:[%s1320_s5 + $0x230] sm:$0xff] %v947_v17  ;;  %v823_v27 = vadd.f32 %v695_v12, %v567_v18  ;;  %v436_v29 = vmul.f32 %v1665_v8, %v301_v15  ;;  %v312_v18 = vld [vmem:[%s1278_s23 + $0x2c8] sm:$0xff] }
  0x5e   : > { %1076 = vst [vmem:[%s1320_s5 + $0x238] sm:$0xff] %v948_v2  ;;  %v570_v28 = vadd.f32 %v1674_v10, %v435_v21  ;;  %v437_v30 = vmul.f32 %v1665_v8, %v302_v16  ;;  %v949_v33 = vmax.f32 %v821_v22, 0.0  ;;  %v824_v35 = vadd.f32 %v696_v19, %v568_v24  ;;  %v311_v2 = vld [vmem:[%s1278_s23 + $0x2c0] sm:$0xff]  ;;  %v708_v24 = vld [vmem:[%s1284_s26 + $0x2b8] sm:$0xff] }
  0x5f   : > { %v950_v34 = vmax.f32 %v822_v23, 0.0  ;;  %v825_v36 = vadd.f32 %v697_v20, %v569_v25  ;;  %v951_v40 = vmax.f32 %v823_v27, 0.0  ;;  %v571_v42 = vadd.f32 %v1674_v10, %v436_v29  ;;  %v707_v23 = vld [vmem:[%s1284_s26 + $0x2b0] sm:$0xff] }
  0x60   : > { %v826_v41 = vadd.f32 %v698_v26, %v570_v28  ;;  %v572_v43 = vadd.f32 %v1674_v10, %v437_v30  ;;  %1077 = vst [vmem:[%s1320_s5 + $0x240] sm:$0xff] %v949_v33  ;;  %v952_v46 = vmax.f32 %v824_v35, 0.0  ;;  %v438_v48 = vmul.f32 %v1665_v8, %v303_v31  ;;  %v313_v25 = vld [vmem:[%s1278_s23 + $0x2d0] sm:$0xff]  ;;  %v314_v30 = vld [vmem:[%s1278_s23 + $0x2d8] sm:$0xff]  ;;  %v315_v31 = vld [vmem:[%s1278_s23 + $0x2e0] sm:$0xff] }
  0x61   : > { %1078 = vst [vmem:[%s1320_s5 + $0x248] sm:$0xff] %v950_v34  ;;  %v953_v47 = vmax.f32 %v825_v36, 0.0  ;;  %v439_v49 = vmul.f32 %v1665_v8, %v304_v32  ;;  %1079 = vst [vmem:[%s1320_s5 + $0x250] sm:$0xff] %v951_v40  ;;  %v827_v52 = vadd.f32 %v699_v37, %v571_v42  ;;  %v440_v56 = vmul.f32 %v1665_v8, %v305_v39  ;;  %v316_v36 = vld [vmem:[%s1278_s23 + $0x2e8] sm:$0xff]  ;;  %v709_v40 = vld [vmem:[%s1284_s26 + $0x2c0] sm:$0xff] }
  0x62   : > { %v954_v51 = vmax.f32 %v826_v41, 0.0  ;;  %v828_v53 = vadd.f32 %v700_v38, %v572_v43  ;;  %1080 = vst [vmem:[%s1320_s5 + $0x258] sm:$0xff] %v952_v46  ;;  %v573_v57 = vadd.f32 %v1674_v10, %v438_v48  ;;  %v441_v60 = vmul.f32 %v1665_v8, %v306_v44  ;;  %v710_v41 = vld [vmem:[%s1284_s26 + $0x2c8] sm:$0xff]  ;;  %v317_v48 = vld [vmem:[%s1278_s23 + $0x2f0] sm:$0xff] }
  0x63   : > { %1081 = vst [vmem:[%s1320_s5 + $0x260] sm:$0xff] %v953_v47  ;;  %v574_v58 = vadd.f32 %v1674_v10, %v439_v49  ;;  %v442_v61 = vmul.f32 %v1665_v8, %v307_v45  ;;  %v955_v1 = vmax.f32 %v827_v52, 0.0  ;;  %v575_v4 = vadd.f32 %v1674_v10, %v440_v56  ;;  %v711_v45 = vld [vmem:[%s1284_s26 + $0x2d0] sm:$0xff]  ;;  %v318_v49 = vld [vmem:[%s1278_s23 + $0x2f8] sm:$0xff] }
  0x64   : > { %1082 = vst [vmem:[%s1320_s5 + $0x268] sm:$0xff] %v954_v51  ;;  %v956_v3 = vmax.f32 %v828_v53, 0.0  ;;  %v443_v7 = vmul.f32 %v1665_v8, %v308_v50  ;;  %v829_v9 = vadd.f32 %v701_v54, %v573_v57  ;;  %v576_v11 = vadd.f32 %v1674_v10, %v441_v60  ;;  %v712_v53 = vld [vmem:[%s1284_s26 + $0x2d8] sm:$0xff]  ;;  %v713_v54 = vld [vmem:[%s1284_s26 + $0x2e0] sm:$0xff]  ;;  %v714_v60 = vld [vmem:[%s1284_s26 + $0x2e8] sm:$0xff] }
  0x65   : > { %v830_v0 = vadd.f32 %v702_v55, %v574_v58  ;;  %v577_v12 = vadd.f32 %v1674_v10, %v442_v61  ;;  %1083 = vst [vmem:[%s1320_s5 + $0x270] sm:$0xff] %v955_v1  ;;  %v831_v14 = vadd.f32 %v703_v59, %v575_v4  ;;  %v444_v16 = vmul.f32 %v1665_v8, %v309_v62  ;;  %v320_v4 = vld [vmem:[%s1278_s23 + $0x308] sm:$0xff] }
  0x66   : > { %1084 = vst [vmem:[%s1320_s5 + $0x278] sm:$0xff] %v956_v3  ;;  %v578_v15 = vadd.f32 %v1674_v10, %v443_v7  ;;  %v445_v17 = vmul.f32 %v1665_v8, %v310_v63  ;;  %v957_v19 = vmax.f32 %v829_v9, 0.0  ;;  %v832_v21 = vadd.f32 %v704_v5, %v576_v11  ;;  %v319_v3 = vld [vmem:[%s1278_s23 + $0x300] sm:$0xff]  ;;  %v716_v11 = vld [vmem:[%s1284_s26 + $0x2f8] sm:$0xff] }
  0x67   : > { %v958_v20 = vmax.f32 %v830_v0, 0.0  ;;  %v833_v22 = vadd.f32 %v705_v6, %v577_v12  ;;  %v959_v26 = vmax.f32 %v831_v14, 0.0  ;;  %v579_v28 = vadd.f32 %v1674_v10, %v444_v16  ;;  %v715_v0 = vld [vmem:[%s1284_s26 + $0x2f0] sm:$0xff] }
  0x68   : > { %v834_v27 = vadd.f32 %v706_v13, %v578_v15  ;;  %v580_v29 = vadd.f32 %v1674_v10, %v445_v17  ;;  %1085 = vst [vmem:[%s1320_s5 + $0x280] sm:$0xff] %v957_v19  ;;  %v960_v32 = vmax.f32 %v832_v21, 0.0  ;;  %v446_v34 = vmul.f32 %v1665_v8, %v311_v2  ;;  %v321_v12 = vld [vmem:[%s1278_s23 + $0x310] sm:$0xff]  ;;  %v322_v17 = vld [vmem:[%s1278_s23 + $0x318] sm:$0xff]  ;;  %v323_v2 = vld [vmem:[%s1278_s23 + $0x320] sm:$0xff] }
  0x69   : > { %1086 = vst [vmem:[%s1320_s5 + $0x288] sm:$0xff] %v958_v20  ;;  %v961_v33 = vmax.f32 %v833_v22, 0.0  ;;  %v447_v35 = vmul.f32 %v1665_v8, %v312_v18  ;;  %1087 = vst [vmem:[%s1320_s5 + $0x290] sm:$0xff] %v959_v26  ;;  %v835_v38 = vadd.f32 %v707_v23, %v579_v28  ;;  %v448_v42 = vmul.f32 %v1665_v8, %v313_v25  ;;  %v324_v22 = vld [vmem:[%s1278_s23 + $0x328] sm:$0xff]  ;;  %v717_v26 = vld [vmem:[%s1284_s26 + $0x300] sm:$0xff] }
  0x6a   : > { %v962_v37 = vmax.f32 %v834_v27, 0.0  ;;  %v836_v39 = vadd.f32 %v708_v24, %v580_v29  ;;  %1088 = vst [vmem:[%s1320_s5 + $0x298] sm:$0xff] %v960_v32  ;;  %v581_v43 = vadd.f32 %v1674_v10, %v446_v34  ;;  %v449_v46 = vmul.f32 %v1665_v8, %v314_v30  ;;  %v718_v27 = vld [vmem:[%s1284_s26 + $0x308] sm:$0xff]  ;;  %v325_v34 = vld [vmem:[%s1278_s23 + $0x330] sm:$0xff] }
  0x6b   : > { %1089 = vst [vmem:[%s1320_s5 + $0x2a0] sm:$0xff] %v961_v33  ;;  %v582_v44 = vadd.f32 %v1674_v10, %v447_v35  ;;  %v450_v47 = vmul.f32 %v1665_v8, %v315_v31  ;;  %v963_v50 = vmax.f32 %v835_v38, 0.0  ;;  %v583_v52 = vadd.f32 %v1674_v10, %v448_v42  ;;  %v719_v31 = vld [vmem:[%s1284_s26 + $0x310] sm:$0xff]  ;;  %v326_v35 = vld [vmem:[%s1278_s23 + $0x338] sm:$0xff] }
  0x6c   : > { %1090 = vst [vmem:[%s1320_s5 + $0x2a8] sm:$0xff] %v962_v37  ;;  %v964_v51 = vmax.f32 %v836_v39, 0.0  ;;  %v451_v55 = vmul.f32 %v1665_v8, %v316_v36  ;;  %v837_v56 = vadd.f32 %v709_v40, %v581_v43  ;;  %v584_v58 = vadd.f32 %v1674_v10, %v449_v46  ;;  %v720_v39 = vld [vmem:[%s1284_s26 + $0x318] sm:$0xff]  ;;  %v721_v40 = vld [vmem:[%s1284_s26 + $0x320] sm:$0xff]  ;;  %v722_v46 = vld [vmem:[%s1284_s26 + $0x328] sm:$0xff] }
  0x6d   : > { %v838_v57 = vadd.f32 %v710_v41, %v582_v44  ;;  %v585_v59 = vadd.f32 %v1674_v10, %v450_v47  ;;  %1091 = vst [vmem:[%s1320_s5 + $0x2b0] sm:$0xff] %v963_v50  ;;  %v839_v61 = vadd.f32 %v711_v45, %v583_v52  ;;  %v452_v63 = vmul.f32 %v1665_v8, %v317_v48  ;;  %v328_v52 = vld [vmem:[%s1278_s23 + $0x348] sm:$0xff] }
  0x6e   : > { %1092 = vst [vmem:[%s1320_s5 + $0x2b8] sm:$0xff] %v964_v51  ;;  %v586_v62 = vadd.f32 %v1674_v10, %v451_v55  ;;  %v453_v1 = vmul.f32 %v1665_v8, %v318_v49  ;;  %v965_v5 = vmax.f32 %v837_v56, 0.0  ;;  %v840_v7 = vadd.f32 %v712_v53, %v584_v58  ;;  %v327_v51 = vld [vmem:[%s1278_s23 + $0x340] sm:$0xff]  ;;  %v724_v58 = vld [vmem:[%s1284_s26 + $0x338] sm:$0xff] }
  0x6f   : > { %v966_v6 = vmax.f32 %v838_v57, 0.0  ;;  %v841_v9 = vadd.f32 %v713_v54, %v585_v59  ;;  %v967_v13 = vmax.f32 %v839_v61, 0.0  ;;  %v587_v15 = vadd.f32 %v1674_v10, %v452_v63  ;;  %v723_v57 = vld [vmem:[%s1284_s26 + $0x330] sm:$0xff] }
  0x70   : > { %v842_v14 = vadd.f32 %v714_v60, %v586_v62  ;;  %v588_v16 = vadd.f32 %v1674_v10, %v453_v1  ;;  %1093 = vst [vmem:[%s1320_s5 + $0x2c0] sm:$0xff] %v965_v5  ;;  %v968_v18 = vmax.f32 %v840_v7, 0.0  ;;  %v454_v20 = vmul.f32 %v1665_v8, %v319_v3  ;;  %v329_v59 = vld [vmem:[%s1278_s23 + $0x350] sm:$0xff]  ;;  %v330_v1 = vld [vmem:[%s1278_s23 + $0x358] sm:$0xff]  ;;  %v331_v3 = vld [vmem:[%s1278_s23 + $0x360] sm:$0xff] }
  0x71   : > { %1094 = vst [vmem:[%s1320_s5 + $0x2c8] sm:$0xff] %v966_v6  ;;  %v969_v19 = vmax.f32 %v841_v9, 0.0  ;;  %v455_v21 = vmul.f32 %v1665_v8, %v320_v4  ;;  %1095 = vst [vmem:[%s1320_s5 + $0x2d0] sm:$0xff] %v967_v13  ;;  %v843_v24 = vadd.f32 %v715_v0, %v587_v15  ;;  %v456_v28 = vmul.f32 %v1665_v8, %v321_v12  ;;  %v332_v9 = vld [vmem:[%s1278_s23 + $0x368] sm:$0xff]  ;;  %v725_v13 = vld [vmem:[%s1284_s26 + $0x340] sm:$0xff] }
  0x72   : > { %v970_v23 = vmax.f32 %v842_v14, 0.0  ;;  %v844_v25 = vadd.f32 %v716_v11, %v588_v16  ;;  %1096 = vst [vmem:[%s1320_s5 + $0x2d8] sm:$0xff] %v968_v18  ;;  %v589_v29 = vadd.f32 %v1674_v10, %v454_v20  ;;  %v457_v32 = vmul.f32 %v1665_v8, %v322_v17  ;;  %v726_v14 = vld [vmem:[%s1284_s26 + $0x348] sm:$0xff]  ;;  %v333_v20 = vld [vmem:[%s1278_s23 + $0x370] sm:$0xff] }
  0x73   : > { %1097 = vst [vmem:[%s1320_s5 + $0x2e0] sm:$0xff] %v969_v19  ;;  %v590_v30 = vadd.f32 %v1674_v10, %v455_v21  ;;  %v458_v33 = vmul.f32 %v1665_v8, %v323_v2  ;;  %v971_v36 = vmax.f32 %v843_v24, 0.0  ;;  %v591_v38 = vadd.f32 %v1674_v10, %v456_v28  ;;  %v727_v2 = vld [vmem:[%s1284_s26 + $0x350] sm:$0xff]  ;;  %v334_v21 = vld [vmem:[%s1278_s23 + $0x378] sm:$0xff] }
  0x74   : > { %1098 = vst [vmem:[%s1320_s5 + $0x2e8] sm:$0xff] %v970_v23  ;;  %v972_v37 = vmax.f32 %v844_v25, 0.0  ;;  %v459_v41 = vmul.f32 %v1665_v8, %v324_v22  ;;  %v845_v42 = vadd.f32 %v717_v26, %v589_v29  ;;  %v592_v44 = vadd.f32 %v1674_v10, %v457_v32  ;;  %v728_v25 = vld [vmem:[%s1284_s26 + $0x358] sm:$0xff]  ;;  %v729_v26 = vld [vmem:[%s1284_s26 + $0x360] sm:$0xff]  ;;  %v730_v32 = vld [vmem:[%s1284_s26 + $0x368] sm:$0xff] }
  0x75   : > { %v846_v43 = vadd.f32 %v718_v27, %v590_v30  ;;  %v593_v45 = vadd.f32 %v1674_v10, %v458_v33  ;;  %1099 = vst [vmem:[%s1320_s5 + $0x2f0] sm:$0xff] %v971_v36  ;;  %v847_v47 = vadd.f32 %v719_v31, %v591_v38  ;;  %v460_v49 = vmul.f32 %v1665_v8, %v325_v34  ;;  %v336_v38 = vld [vmem:[%s1278_s23 + $0x388] sm:$0xff] }
  0x76   : > { %1100 = vst [vmem:[%s1320_s5 + $0x2f8] sm:$0xff] %v972_v37  ;;  %v594_v48 = vadd.f32 %v1674_v10, %v459_v41  ;;  %v461_v50 = vmul.f32 %v1665_v8, %v326_v35  ;;  %v973_v53 = vmax.f32 %v845_v42, 0.0  ;;  %v848_v55 = vadd.f32 %v720_v39, %v592_v44  ;;  %v335_v37 = vld [vmem:[%s1278_s23 + $0x380] sm:$0xff]  ;;  %v732_v44 = vld [vmem:[%s1284_s26 + $0x378] sm:$0xff] }
  0x77   : > { %v974_v54 = vmax.f32 %v846_v43, 0.0  ;;  %v849_v56 = vadd.f32 %v721_v40, %v593_v45  ;;  %v975_v60 = vmax.f32 %v847_v47, 0.0  ;;  %v595_v62 = vadd.f32 %v1674_v10, %v460_v49  ;;  %v731_v43 = vld [vmem:[%s1284_s26 + $0x370] sm:$0xff] }
  0x78   : > { %v850_v61 = vadd.f32 %v722_v46, %v594_v48  ;;  %v596_v63 = vadd.f32 %v1674_v10, %v461_v50  ;;  %1101 = vst [vmem:[%s1320_s5 + $0x300] sm:$0xff] %v973_v53  ;;  %v976_v4 = vmax.f32 %v848_v55, 0.0  ;;  %v462_v6 = vmul.f32 %v1665_v8, %v327_v51  ;;  %v337_v45 = vld [vmem:[%s1278_s23 + $0x390] sm:$0xff]  ;;  %v338_v50 = vld [vmem:[%s1278_s23 + $0x398] sm:$0xff]  ;;  %v339_v51 = vld [vmem:[%s1278_s23 + $0x3a0] sm:$0xff] }
  0x79   : > { %1102 = vst [vmem:[%s1320_s5 + $0x308] sm:$0xff] %v974_v54  ;;  %v977_v5 = vmax.f32 %v849_v56, 0.0  ;;  %v463_v7 = vmul.f32 %v1665_v8, %v328_v52  ;;  %1103 = vst [vmem:[%s1320_s5 + $0x310] sm:$0xff] %v975_v60  ;;  %v851_v11 = vadd.f32 %v723_v57, %v595_v62  ;;  %v464_v15 = vmul.f32 %v1665_v8, %v329_v59  ;;  %v340_v56 = vld [vmem:[%s1278_s23 + $0x3a8] sm:$0xff]  ;;  %v733_v60 = vld [vmem:[%s1284_s26 + $0x380] sm:$0xff] }
  0x7a   : > { %v978_v0 = vmax.f32 %v850_v61, 0.0  ;;  %v852_v12 = vadd.f32 %v724_v58, %v596_v63  ;;  %1104 = vst [vmem:[%s1320_s5 + $0x318] sm:$0xff] %v976_v4  ;;  %v597_v16 = vadd.f32 %v1674_v10, %v462_v6  ;;  %v465_v18 = vmul.f32 %v1665_v8, %v330_v1  ;;  %v734_v61 = vld [vmem:[%s1284_s26 + $0x388] sm:$0xff]  ;;  %v341_v6 = vld [vmem:[%s1278_s23 + $0x3b0] sm:$0xff] }
  0x7b   : > { %1105 = vst [vmem:[%s1320_s5 + $0x320] sm:$0xff] %v977_v5  ;;  %v598_v17 = vadd.f32 %v1674_v10, %v463_v7  ;;  %v466_v19 = vmul.f32 %v1665_v8, %v331_v3  ;;  %v979_v22 = vmax.f32 %v851_v11, 0.0  ;;  %v599_v24 = vadd.f32 %v1674_v10, %v464_v15  ;;  %v735_v3 = vld [vmem:[%s1284_s26 + $0x390] sm:$0xff]  ;;  %v342_v7 = vld [vmem:[%s1278_s23 + $0x3b8] sm:$0xff] }
  0x7c   : > { %1106 = vst [vmem:[%s1320_s5 + $0x328] sm:$0xff] %v978_v0  ;;  %v980_v23 = vmax.f32 %v852_v12, 0.0  ;;  %v467_v27 = vmul.f32 %v1665_v8, %v332_v9  ;;  %v853_v28 = vadd.f32 %v725_v13, %v597_v16  ;;  %v600_v30 = vadd.f32 %v1674_v10, %v465_v18  ;;  %v736_v12 = vld [vmem:[%s1284_s26 + $0x398] sm:$0xff]  ;;  %v737_v13 = vld [vmem:[%s1284_s26 + $0x3a0] sm:$0xff]  ;;  %v738_v18 = vld [vmem:[%s1284_s26 + $0x3a8] sm:$0xff] }
  0x7d   : > { %v854_v29 = vadd.f32 %v726_v14, %v598_v17  ;;  %v601_v31 = vadd.f32 %v1674_v10, %v466_v19  ;;  %1107 = vst [vmem:[%s1320_s5 + $0x330] sm:$0xff] %v979_v22  ;;  %v855_v33 = vadd.f32 %v727_v2, %v599_v24  ;;  %v468_v35 = vmul.f32 %v1665_v8, %v333_v20  ;;  %v344_v24 = vld [vmem:[%s1278_s23 + $0x3c8] sm:$0xff] }
  0x7e   : > { %1108 = vst [vmem:[%s1320_s5 + $0x338] sm:$0xff] %v980_v23  ;;  %v602_v34 = vadd.f32 %v1674_v10, %v467_v27  ;;  %v469_v36 = vmul.f32 %v1665_v8, %v334_v21  ;;  %v981_v39 = vmax.f32 %v853_v28, 0.0  ;;  %v856_v41 = vadd.f32 %v728_v25, %v600_v30  ;;  %v343_v23 = vld [vmem:[%s1278_s23 + $0x3c0] sm:$0xff]  ;;  %v740_v30 = vld [vmem:[%s1284_s26 + $0x3b8] sm:$0xff] }
  0x7f   : > { %v982_v40 = vmax.f32 %v854_v29, 0.0  ;;  %v857_v42 = vadd.f32 %v729_v26, %v601_v31  ;;  %v983_v46 = vmax.f32 %v855_v33, 0.0  ;;  %v603_v48 = vadd.f32 %v1674_v10, %v468_v35  ;;  %v739_v29 = vld [vmem:[%s1284_s26 + $0x3b0] sm:$0xff] }
  0x80   : > { %v858_v47 = vadd.f32 %v730_v32, %v602_v34  ;;  %v604_v49 = vadd.f32 %v1674_v10, %v469_v36  ;;  %1109 = vst [vmem:[%s1320_s5 + $0x340] sm:$0xff] %v981_v39  ;;  %v984_v52 = vmax.f32 %v856_v41, 0.0  ;;  %v470_v54 = vmul.f32 %v1665_v8, %v335_v37  ;;  %v345_v31 = vld [vmem:[%s1278_s23 + $0x3d0] sm:$0xff]  ;;  %v346_v36 = vld [vmem:[%s1278_s23 + $0x3d8] sm:$0xff]  ;;  %v347_v37 = vld [vmem:[%s1278_s23 + $0x3e0] sm:$0xff] }
  0x81   : > { %1110 = vst [vmem:[%s1320_s5 + $0x348] sm:$0xff] %v982_v40  ;;  %v985_v53 = vmax.f32 %v857_v42, 0.0  ;;  %v471_v55 = vmul.f32 %v1665_v8, %v336_v38  ;;  %1111 = vst [vmem:[%s1320_s5 + $0x350] sm:$0xff] %v983_v46  ;;  %v859_v58 = vadd.f32 %v731_v43, %v603_v48  ;;  %v472_v62 = vmul.f32 %v1665_v8, %v337_v45  ;;  %v348_v42 = vld [vmem:[%s1278_s23 + $0x3e8] sm:$0xff]  ;;  %v741_v46 = vld [vmem:[%s1284_s26 + $0x3c0] sm:$0xff] }
  0x82   : > { %v986_v57 = vmax.f32 %v858_v47, 0.0  ;;  %v860_v59 = vadd.f32 %v732_v44, %v604_v49  ;;  %1112 = vst [vmem:[%s1320_s5 + $0x358] sm:$0xff] %v984_v52  ;;  %v605_v63 = vadd.f32 %v1674_v10, %v470_v54  ;;  %v473_v4 = vmul.f32 %v1665_v8, %v338_v50  ;;  %v742_v47 = vld [vmem:[%s1284_s26 + $0x3c8] sm:$0xff]  ;;  %v349_v54 = vld [vmem:[%s1278_s23 + $0x3f0] sm:$0xff] }
  0x83   : > { %1113 = vst [vmem:[%s1320_s5 + $0x360] sm:$0xff] %v985_v53  ;;  %v606_v1 = vadd.f32 %v1674_v10, %v471_v55  ;;  %v474_v5 = vmul.f32 %v1665_v8, %v339_v51  ;;  %v987_v9 = vmax.f32 %v859_v58, 0.0  ;;  %v607_v11 = vadd.f32 %v1674_v10, %v472_v62  ;;  %v743_v51 = vld [vmem:[%s1284_s26 + $0x3d0] sm:$0xff]  ;;  %v350_v55 = vld [vmem:[%s1278_s23 + $0x3f8] sm:$0xff] }
  0x84   : > { %1114 = vst [vmem:[%s1320_s5 + $0x368] sm:$0xff] %v986_v57  ;;  %v988_v0 = vmax.f32 %v860_v59, 0.0  ;;  %v475_v14 = vmul.f32 %v1665_v8, %v340_v56  ;;  %v861_v15 = vadd.f32 %v733_v60, %v605_v63  ;;  %v608_v17 = vadd.f32 %v1674_v10, %v473_v4  ;;  %v744_v59 = vld [vmem:[%s1284_s26 + $0x3d8] sm:$0xff]  ;;  %v745_v60 = vld [vmem:[%s1284_s26 + $0x3e0] sm:$0xff]  ;;  %v746_v4 = vld [vmem:[%s1284_s26 + $0x3e8] sm:$0xff] }
  0x85   : > { %v862_v16 = vadd.f32 %v734_v61, %v606_v1  ;;  %v609_v2 = vadd.f32 %v1674_v10, %v474_v5  ;;  %1115 = vst [vmem:[%s1320_s5 + $0x370] sm:$0xff] %v987_v9  ;;  %v863_v19 = vadd.f32 %v735_v3, %v607_v11  ;;  %v476_v21 = vmul.f32 %v1665_v8, %v341_v6 }
  0x86   : > { %1116 = vst [vmem:[%s1320_s5 + $0x378] sm:$0xff] %v988_v0  ;;  %v610_v20 = vadd.f32 %v1674_v10, %v475_v14  ;;  %v477_v22 = vmul.f32 %v1665_v8, %v342_v7  ;;  %v989_v25 = vmax.f32 %v861_v15, 0.0  ;;  %v864_v27 = vadd.f32 %v736_v12, %v608_v17  ;;  %v747_v14 = vld [vmem:[%s1284_s26 + $0x3f0] sm:$0xff]  ;;  %v748_v15 = vld [vmem:[%s1284_s26 + $0x3f8] sm:$0xff] }
  0x87   : > { %v990_v26 = vmax.f32 %v862_v16, 0.0  ;;  %v865_v28 = vadd.f32 %v737_v13, %v609_v2  ;;  %v991_v32 = vmax.f32 %v863_v19, 0.0  ;;  %v611_v34 = vadd.f32 %v1674_v10, %v476_v21 }
  0x88   : > { %v866_v33 = vadd.f32 %v738_v18, %v610_v20  ;;  %v612_v35 = vadd.f32 %v1674_v10, %v477_v22  ;;  %1117 = vst [vmem:[%s1320_s5 + $0x380] sm:$0xff] %v989_v25  ;;  %v992_v38 = vmax.f32 %v864_v27, 0.0  ;;  %v478_v40 = vmul.f32 %v1665_v8, %v343_v23 }
  0x89   : > { %1118 = vst [vmem:[%s1320_s5 + $0x388] sm:$0xff] %v990_v26  ;;  %v993_v39 = vmax.f32 %v865_v28, 0.0  ;;  %v479_v41 = vmul.f32 %v1665_v8, %v344_v24  ;;  %1119 = vst [vmem:[%s1320_s5 + $0x390] sm:$0xff] %v991_v32  ;;  %v867_v44 = vadd.f32 %v739_v29, %v611_v34  ;;  %v480_v48 = vmul.f32 %v1665_v8, %v345_v31 }
  0x8a   : > { %v994_v43 = vmax.f32 %v866_v33, 0.0  ;;  %v868_v45 = vadd.f32 %v740_v30, %v612_v35  ;;  %1120 = vst [vmem:[%s1320_s5 + $0x398] sm:$0xff] %v992_v38  ;;  %v613_v49 = vadd.f32 %v1674_v10, %v478_v40  ;;  %v481_v52 = vmul.f32 %v1665_v8, %v346_v36 }
  0x8b   : > { %1121 = vst [vmem:[%s1320_s5 + $0x3a0] sm:$0xff] %v993_v39  ;;  %v614_v50 = vadd.f32 %v1674_v10, %v479_v41  ;;  %v482_v53 = vmul.f32 %v1665_v8, %v347_v37  ;;  %v995_v56 = vmax.f32 %v867_v44, 0.0  ;;  %v615_v58 = vadd.f32 %v1674_v10, %v480_v48 }
  0x8c   : > { %1122 = vst [vmem:[%s1320_s5 + $0x3a8] sm:$0xff] %v994_v43  ;;  %v996_v57 = vmax.f32 %v868_v45, 0.0  ;;  %v483_v61 = vmul.f32 %v1665_v8, %v348_v42  ;;  %v869_v62 = vadd.f32 %v741_v46, %v613_v49  ;;  %v616_v1 = vadd.f32 %v1674_v10, %v481_v52 }
  0x8d   : > { %v870_v63 = vadd.f32 %v742_v47, %v614_v50  ;;  %v617_v3 = vadd.f32 %v1674_v10, %v482_v53  ;;  %1123 = vst [vmem:[%s1320_s5 + $0x3b0] sm:$0xff] %v995_v56  ;;  %v871_v5 = vadd.f32 %v743_v51, %v615_v58  ;;  %v484_v7 = vmul.f32 %v1665_v8, %v349_v54 }
  0x8e   : > { %1124 = vst [vmem:[%s1320_s5 + $0x3b8] sm:$0xff] %v996_v57  ;;  %v618_v6 = vadd.f32 %v1674_v10, %v483_v61  ;;  %v485_v9 = vmul.f32 %v1665_v8, %v350_v55  ;;  %v997_v0 = vmax.f32 %v869_v62, 0.0  ;;  %v872_v12 = vadd.f32 %v744_v59, %v616_v1 }
  0x8f   : > { %v998_v11 = vmax.f32 %v870_v63, 0.0  ;;  %v873_v13 = vadd.f32 %v745_v60, %v617_v3  ;;  %v999_v16 = vmax.f32 %v871_v5, 0.0  ;;  %v619_v2 = vadd.f32 %v1674_v10, %v484_v7 }
  0x90   : > { %v874_v17 = vadd.f32 %v746_v4, %v618_v6  ;;  %v620_v18 = vadd.f32 %v1674_v10, %v485_v9  ;;  %1125 = vst [vmem:[%s1320_s5 + $0x3c0] sm:$0xff] %v997_v0  ;;  %v1000_v8 = vmax.f32 %v872_v12, 0.0 }
  0x91   : > { %1126 = vst [vmem:[%s1320_s5 + $0x3c8] sm:$0xff] %v998_v11  ;;  %v1001_v19 = vmax.f32 %v873_v13, 0.0  ;;  %1127 = vst [vmem:[%s1320_s5 + $0x3d0] sm:$0xff] %v999_v16  ;;  %v875_v21 = vadd.f32 %v747_v14, %v619_v2 }
  0x92   : > { %v1002_v20 = vmax.f32 %v874_v17, 0.0  ;;  %v876_v22 = vadd.f32 %v748_v15, %v620_v18  ;;  %1128 = vst [vmem:[%s1320_s5 + $0x3d8] sm:$0xff] %v1000_v8 }
  0x93   : > { %1129 = vst [vmem:[%s1320_s5 + $0x3e0] sm:$0xff] %v1001_v19  ;;  %v1003_v23 = vmax.f32 %v875_v21, 0.0 }
  0x94   : > { %1130 = vst [vmem:[%s1320_s5 + $0x3e8] sm:$0xff] %v1002_v20  ;;  %v1004_v24 = vmax.f32 %v876_v22, 0.0 }
  0x95   : > { %1131 = vst [vmem:[%s1320_s5 + $0x3f0] sm:$0xff] %v1003_v23 }
  0x96   : > { %1132 = vst [vmem:[%s1320_s5 + $0x3f8] sm:$0xff] %v1004_v24 }
  0x97 PF: > { %s14_s15 = sadd.s32 1, %s1232_s15  }
  0x98   : > { %p11_p4 = scmp.ge.s32.totalorder %s14_s15, 6  }
  0x9a   :  { %13 = sbr.rel (!%p11_p4) target bundleno = 1 (0x1), region = 69 }

</bundles_post_ra>
